<compile_context>
chip_gen: v6e
topology: v6e:2x2x1
jax: 0.10.0
libtpu: 0.0.40
codegen_flags: <defaults>
</compile_context>

<pallas_src>
import functools

import jax
import jax.numpy as jnp
from jax.experimental import pallas as pl
from jax.experimental.pallas import tpu as pltpu


# ---------------------------------------------------------------------------
# Kernel: full multi-layer LSTM over the whole sequence
# ---------------------------------------------------------------------------
def lstm_encoder_kernel(emb_ref,   # (L, Bp, X)            padded embedded sequence
                        wx_ref,    # (num_layers, X, 4H)   W_ih^T per layer (zero-padded rows)
                        wh_ref,    # (num_layers, H, 4H)   W_hh^T per layer
                        b_ref,     # (num_layers, 1, 4H)   b_ih + b_hh per layer
                        out_ref,   # (L + 2*num_layers, Bp, H)  [out seq | h_n | c_n]
                        xbuf_ref,  # scratch (L, Bp, H)     inter-layer activations
                        *, num_layers, hidden_dim):
    L, Bp, X = emb_ref.shape
    H = hidden_dim
    G = 4 * H
    f32 = jnp.float32

    # Weights stay resident in VMEM; load the small slabs once.
    wx = wx_ref[...]
    wh = wh_ref[...]
    b = b_ref[...]

    for l in range(num_layers):
        if l == 0:
            x2d = emb_ref[...].reshape(L * Bp, X)
            k = X
        else:
            x2d = xbuf_ref[...].reshape(L * Bp, H)
            k = H

        # One big MXU matmul for the whole sequence's input-side gate contribution.
        gi = jnp.dot(x2d, wx[l, :k, :], preferred_element_type=f32) + b[l]   # (L*Bp, 4H)
        gi = gi.reshape(L, Bp, G)
        w_h = wh[l]                                                          # (H, 4H)

        h = jnp.zeros((Bp, H), f32)
        c = jnp.zeros((Bp, H), f32)
        for t in range(L):
            gates = gi[t] + jnp.dot(h, w_h, preferred_element_type=f32)      # (Bp, 4H)
            i_g = jax.nn.sigmoid(gates[:, 0:H])
            f_g = jax.nn.sigmoid(gates[:, H:2 * H])
            g_g = jnp.tanh(gates[:, 2 * H:3 * H])
            o_g = jax.nn.sigmoid(gates[:, 3 * H:4 * H])
            c = f_g * c + i_g * g_g
            h = o_g * jnp.tanh(c)
            if l == num_layers - 1:
                out_ref[t] = h          # top-layer output sequence
            else:
                xbuf_ref[t] = h         # feeds the next layer

        out_ref[L + l] = h              # final hidden state of this layer
        out_ref[L + num_layers + l] = c  # final cell state of this layer


# ---------------------------------------------------------------------------
# Wrapper (one-time prep: embedding gather, padding, weight packing)
# ---------------------------------------------------------------------------
def luong_encoder_forward(params, input_ids):
    """
    input_ids: (L, B) int32
    returns (output (L, B, H), (h_n (num_layers, B, H), c_n (num_layers, B, H)))
    """
    L, B = input_ids.shape
    _, E = params["embedding"].shape
    lstm = params["lstm"]
    num_layers = len(lstm)
    H = lstm[0]["w_hh"].shape[1]
    G = 4 * H
    Bp = ((B + 7) // 8) * 8          # pad batch to full sublane count
    X = max(E, H)                    # common padded input width across layers

    # --- one-time prep in plain JAX (not per-step work) ---
    emb = jnp.take(params["embedding"], input_ids.reshape(-1), axis=0).reshape(L, B, E)
    emb_pad = jnp.zeros((L, Bp, X), jnp.float32).at[:, :B, :E].set(emb)

    wx_list, wh_list, b_list = [], [], []
    for l, p in enumerate(lstm):
        in_l = E if l == 0 else H
        wx = jnp.zeros((X, G), jnp.float32).at[:in_l, :].set(p["w_ih"].T)
        wx_list.append(wx)
        wh_list.append(p["w_hh"].T)                         # (H, 4H)
        b_list.append((p["b_ih"] + p["b_hh"])[None, :])     # (1, 4H)
    wx_all = jnp.stack(wx_list)      # (num_layers, X, 4H)
    wh_all = jnp.stack(wh_list)      # (num_layers, H, 4H)
    b_all = jnp.stack(b_list)        # (num_layers, 1, 4H)

    vmem_spec = pl.BlockSpec(memory_space=pltpu.MemorySpace.VMEM)

    out_slab = pl.pallas_call(
        functools.partial(lstm_encoder_kernel,
                          num_layers=num_layers, hidden_dim=H),
        out_shape=jax.ShapeDtypeStruct((L + 2 * num_layers, Bp, H), jnp.float32),
        in_specs=[vmem_spec] * 4,
        out_specs=vmem_spec,
        scratch_shapes=[pltpu.VMEM((L, Bp, H), jnp.float32)],
    )(emb_pad, wx_all, wh_all, b_all)

    output = out_slab[:L, :B, :]
    h_n = out_slab[L:L + num_layers, :B, :]
    c_n = out_slab[L + num_layers:, :B, :]
    return output, (h_n, c_n)


# ---------------------------------------------------------------------------
# Pure-JAX reference (mirrors PyTorch nn.Embedding + nn.LSTM forward)
# ---------------------------------------------------------------------------
def reference_forward(params, input_ids):
    L, B = input_ids.shape
    H = params["lstm"][0]["w_hh"].shape[1]
    x_seq = params["embedding"][input_ids]               # (L, B, E)
    h_fin, c_fin = [], []
    for p in params["lstm"]:
        h = jnp.zeros((B, H), jnp.float32)
        c = jnp.zeros((B, H), jnp.float32)
        outs = []
        for t in range(L):
            gates = (x_seq[t] @ p["w_ih"].T + p["b_ih"]
                     + h @ p["w_hh"].T + p["b_hh"])
            i_g = jax.nn.sigmoid(gates[:, 0:H])
            f_g = jax.nn.sigmoid(gates[:, H:2 * H])
            g_g = jnp.tanh(gates[:, 2 * H:3 * H])
            o_g = jax.nn.sigmoid(gates[:, 3 * H:4 * H])
            c = f_g * c + i_g * g_g
            h = o_g * jnp.tanh(c)
            outs.append(h)
        x_seq = jnp.stack(outs, axis=0)
        h_fin.append(h)
        c_fin.append(c)
    return x_seq, (jnp.stack(h_fin), jnp.stack(c_fin))


# ---------------------------------------------------------------------------
# Main
# ---------------------------------------------------------------------------
if __name__ == "__main__":
    input_dim = 32     # vocab size
    embed_dim = 16     # E
    hidden_dim = 32    # H
    num_layers = 2
    L, B = 8, 2
    G = 4 * hidden_dim

    key = jax.random.PRNGKey(0)
    ks = jax.random.split(key, 2 + 4 * num_layers)

    def init(k, shape, scale=0.1):
        return (scale * jax.random.normal(k, shape)).astype(jnp.float32)

    lstm_params = []
    for l in range(num_layers):
        in_l = embed_dim if l == 0 else hidden_dim
        base = 2 + 4 * l
        lstm_params.append({
            "w_ih": init(ks[base + 0], (G, in_l)),
            "w_hh": init(ks[base + 1], (G, hidden_dim)),
            "b_ih": init(ks[base + 2], (G,)),
            "b_hh": init(ks[base + 3], (G,)),
        })
    params = {
        "embedding": init(ks[0], (input_dim, embed_dim), scale=1.0),
        "lstm": lstm_params,
    }

    input_ids = jax.random.randint(ks[1], (L, B), 0, input_dim, dtype=jnp.int32)

    forward = jax.jit(luong_encoder_forward)
    out, (h_n, c_n) = jax.block_until_ready(forward(params, input_ids))

    ref_out, (ref_h, ref_c) = reference_forward(params, input_ids)
    assert out.shape == (L, B, hidden_dim)
    assert h_n.shape == (num_layers, B, hidden_dim)
    assert c_n.shape == (num_layers, B, hidden_dim)
    assert jnp.max(jnp.abs(out - ref_out)) < 1e-4
    assert jnp.max(jnp.abs(h_n - ref_h)) < 1e-4
    assert jnp.max(jnp.abs(c_n - ref_c)) < 1e-4

    print("KERNEL_OK")
</pallas_src>

<mosaic_0001>
module attributes {stable_mosaic.version = 11 : i64} {
  func.func @lstm_encoder_kernel(%arg0: memref<8x8x32xf32, #tpu.memory_space<vmem>>, %arg1: memref<2x32x128xf32, #tpu.memory_space<vmem>>, %arg2: memref<2x32x128xf32, #tpu.memory_space<vmem>>, %arg3: memref<2x1x128xf32, #tpu.memory_space<vmem>>, %arg4: memref<12x8x32xf32, #tpu.memory_space<vmem>>, %arg5: memref<8x8x32xf32, #tpu.memory_space<vmem>>) attributes {dimension_semantics = [], scalar_prefetch = 0 : i64, scratch_operands = 1 : i64, tpu.core_type = #tpu.core_type<tc>} {
    %c0 = arith.constant 0 : index
    %c0_0 = arith.constant 0 : index
    %c0_1 = arith.constant 0 : index
    %0 = vector.load %arg1[%c0, %c0_0, %c0_1] : memref<2x32x128xf32, #tpu.memory_space<vmem>>, vector<2x32x128xf32>
    %c0_2 = arith.constant 0 : index
    %c0_3 = arith.constant 0 : index
    %c0_4 = arith.constant 0 : index
    %1 = vector.load %arg2[%c0_2, %c0_3, %c0_4] : memref<2x32x128xf32, #tpu.memory_space<vmem>>, vector<2x32x128xf32>
    %c0_5 = arith.constant 0 : index
    %c0_6 = arith.constant 0 : index
    %c0_7 = arith.constant 0 : index
    %2 = vector.load %arg3[%c0_5, %c0_6, %c0_7] : memref<2x1x128xf32, #tpu.memory_space<vmem>>, vector<2x1x128xf32>
    %c0_8 = arith.constant 0 : index
    %c0_9 = arith.constant 0 : index
    %c0_10 = arith.constant 0 : index
    %3 = vector.load %arg0[%c0_8, %c0_9, %c0_10] : memref<8x8x32xf32, #tpu.memory_space<vmem>>, vector<8x8x32xf32>
    %4 = vector.shape_cast %3 : vector<8x8x32xf32> to vector<64x32xf32>
    %5 = vector.extract_strided_slice %0 {offsets = [0, 0, 0], sizes = [1, 32, 128], strides = [1, 1, 1]} : vector<2x32x128xf32> to vector<1x32x128xf32>
    %6 = vector.shape_cast %5 : vector<1x32x128xf32> to vector<32x128xf32>
    %cst = arith.constant dense<0.000000e+00> : vector<64x128xf32>
    %7 = tpu.matmul %4, %6, %cst {dimension_numbers = #tpu.dot_dimension_numbers<[1], [0], [0], [1], [0, 0, 1, 1], [], []>} : vector<64x32xf32>, vector<32x128xf32>, vector<64x128xf32> -> vector<64x128xf32>
    %8 = vector.extract_strided_slice %2 {offsets = [0, 0, 0], sizes = [1, 1, 128], strides = [1, 1, 1]} : vector<2x1x128xf32> to vector<1x1x128xf32>
    %9 = vector.shape_cast %8 : vector<1x1x128xf32> to vector<1x128xf32>
    %10 = vector.broadcast %9 : vector<1x128xf32> to vector<64x128xf32>
    %11 = arith.addf %7, %10 : vector<64x128xf32>
    %12 = vector.shape_cast %11 : vector<64x128xf32> to vector<8x8x128xf32>
    %13 = vector.extract_strided_slice %1 {offsets = [0, 0, 0], sizes = [1, 32, 128], strides = [1, 1, 1]} : vector<2x32x128xf32> to vector<1x32x128xf32>
    %14 = vector.shape_cast %13 : vector<1x32x128xf32> to vector<32x128xf32>
    %cst_11 = arith.constant 0.000000e+00 : f32
    %15 = vector.broadcast %cst_11 : f32 to vector<8x32xf32>
    %cst_12 = arith.constant 0.000000e+00 : f32
    %16 = vector.broadcast %cst_12 : f32 to vector<8x32xf32>
    %17 = vector.extract_strided_slice %12 {offsets = [0, 0, 0], sizes = [1, 8, 128], strides = [1, 1, 1]} : vector<8x8x128xf32> to vector<1x8x128xf32>
    %18 = vector.shape_cast %17 : vector<1x8x128xf32> to vector<8x128xf32>
    %cst_13 = arith.constant dense<0.000000e+00> : vector<8x128xf32>
    %19 = tpu.matmul %15, %14, %cst_13 {dimension_numbers = #tpu.dot_dimension_numbers<[1], [0], [0], [1], [0, 0, 1, 1], [], []>} : vector<8x32xf32>, vector<32x128xf32>, vector<8x128xf32> -> vector<8x128xf32>
    %20 = arith.addf %18, %19 : vector<8x128xf32>
    %21 = vector.extract_strided_slice %20 {offsets = [0, 0], sizes = [8, 32], strides = [1, 1]} : vector<8x128xf32> to vector<8x32xf32>
    %22 = arith.negf %21 : vector<8x32xf32>
    %23 = math.exp %22 : vector<8x32xf32>
    %cst_14 = arith.constant 1.000000e+00 : f32
    %24 = vector.broadcast %cst_14 : f32 to vector<8x32xf32>
    %25 = arith.addf %24, %23 : vector<8x32xf32>
    %26 = arith.divf %24, %25 : vector<8x32xf32>
    %27 = vector.extract_strided_slice %20 {offsets = [0, 32], sizes = [8, 32], strides = [1, 1]} : vector<8x128xf32> to vector<8x32xf32>
    %28 = arith.negf %27 : vector<8x32xf32>
    %29 = math.exp %28 : vector<8x32xf32>
    %cst_15 = arith.constant 1.000000e+00 : f32
    %30 = vector.broadcast %cst_15 : f32 to vector<8x32xf32>
    %31 = arith.addf %30, %29 : vector<8x32xf32>
    %32 = arith.divf %30, %31 : vector<8x32xf32>
    %33 = vector.extract_strided_slice %20 {offsets = [0, 64], sizes = [8, 32], strides = [1, 1]} : vector<8x128xf32> to vector<8x32xf32>
    %34 = math.tanh %33 : vector<8x32xf32>
    %35 = vector.extract_strided_slice %20 {offsets = [0, 96], sizes = [8, 32], strides = [1, 1]} : vector<8x128xf32> to vector<8x32xf32>
    %36 = arith.negf %35 : vector<8x32xf32>
    %37 = math.exp %36 : vector<8x32xf32>
    %cst_16 = arith.constant 1.000000e+00 : f32
    %38 = vector.broadcast %cst_16 : f32 to vector<8x32xf32>
    %39 = arith.addf %38, %37 : vector<8x32xf32>
    %40 = arith.divf %38, %39 : vector<8x32xf32>
    %41 = arith.mulf %32, %16 : vector<8x32xf32>
    %42 = arith.mulf %26, %34 : vector<8x32xf32>
    %43 = arith.addf %41, %42 : vector<8x32xf32>
    %44 = math.tanh %43 : vector<8x32xf32>
    %45 = arith.mulf %40, %44 : vector<8x32xf32>
    %c0_17 = arith.constant 0 : index
    %c0_18 = arith.constant 0 : index
    %c0_19 = arith.constant 0 : index
    %46 = vector.load %arg5[%c0_17, %c0_18, %c0_19] : memref<8x8x32xf32, #tpu.memory_space<vmem>>, vector<1x8x32xf32>
    %47 = vector.shape_cast %46 : vector<1x8x32xf32> to vector<8x32xf32>
    %48 = vector.shape_cast %45 : vector<8x32xf32> to vector<1x8x32xf32>
    tpu.vector_store %arg5[%c0_17, %c0_18, %c0_19], %48 {strides = array<i32>} : memref<8x8x32xf32, #tpu.memory_space<vmem>>, vector<1x8x32xf32>,
    %49 = vector.extract_strided_slice %12 {offsets = [1, 0, 0], sizes = [1, 8, 128], strides = [1, 1, 1]} : vector<8x8x128xf32> to vector<1x8x128xf32>
    %50 = vector.shape_cast %49 : vector<1x8x128xf32> to vector<8x128xf32>
    %cst_20 = arith.constant dense<0.000000e+00> : vector<8x128xf32>
    %51 = tpu.matmul %45, %14, %cst_20 {dimension_numbers = #tpu.dot_dimension_numbers<[1], [0], [0], [1], [0, 0, 1, 1], [], []>} : vector<8x32xf32>, vector<32x128xf32>, vector<8x128xf32> -> vector<8x128xf32>
    %52 = arith.addf %50, %51 : vector<8x128xf32>
    %53 = vector.extract_strided_slice %52 {offsets = [0, 0], sizes = [8, 32], strides = [1, 1]} : vector<8x128xf32> to vector<8x32xf32>
    %54 = arith.negf %53 : vector<8x32xf32>
    %55 = math.exp %54 : vector<8x32xf32>
    %cst_21 = arith.constant 1.000000e+00 : f32
    %56 = vector.broadcast %cst_21 : f32 to vector<8x32xf32>
    %57 = arith.addf %56, %55 : vector<8x32xf32>
    %58 = arith.divf %56, %57 : vector<8x32xf32>
    %59 = vector.extract_strided_slice %52 {offsets = [0, 32], sizes = [8, 32], strides = [1, 1]} : vector<8x128xf32> to vector<8x32xf32>
    %60 = arith.negf %59 : vector<8x32xf32>
    %61 = math.exp %60 : vector<8x32xf32>
    %cst_22 = arith.constant 1.000000e+00 : f32
    %62 = vector.broadcast %cst_22 : f32 to vector<8x32xf32>
    %63 = arith.addf %62, %61 : vector<8x32xf32>
    %64 = arith.divf %62, %63 : vector<8x32xf32>
    %65 = vector.extract_strided_slice %52 {offsets = [0, 64], sizes = [8, 32], strides = [1, 1]} : vector<8x128xf32> to vector<8x32xf32>
    %66 = math.tanh %65 : vector<8x32xf32>
    %67 = vector.extract_strided_slice %52 {offsets = [0, 96], sizes = [8, 32], strides = [1, 1]} : vector<8x128xf32> to vector<8x32xf32>
    %68 = arith.negf %67 : vector<8x32xf32>
    %69 = math.exp %68 : vector<8x32xf32>
    %cst_23 = arith.constant 1.000000e+00 : f32
    %70 = vector.broadcast %cst_23 : f32 to vector<8x32xf32>
    %71 = arith.addf %70, %69 : vector<8x32xf32>
    %72 = arith.divf %70, %71 : vector<8x32xf32>
    %73 = arith.mulf %64, %43 : vector<8x32xf32>
    %74 = arith.mulf %58, %66 : vector<8x32xf32>
    %75 = arith.addf %73, %74 : vector<8x32xf32>
    %76 = math.tanh %75 : vector<8x32xf32>
    %77 = arith.mulf %72, %76 : vector<8x32xf32>
    %c1 = arith.constant 1 : index
    %c0_24 = arith.constant 0 : index
    %c0_25 = arith.constant 0 : index
    %78 = vector.load %arg5[%c1, %c0_24, %c0_25] : memref<8x8x32xf32, #tpu.memory_space<vmem>>, vector<1x8x32xf32>
    %79 = vector.shape_cast %78 : vector<1x8x32xf32> to vector<8x32xf32>
    %80 = vector.shape_cast %77 : vector<8x32xf32> to vector<1x8x32xf32>
    tpu.vector_store %arg5[%c1, %c0_24, %c0_25], %80 {strides = array<i32>} : memref<8x8x32xf32, #tpu.memory_space<vmem>>, vector<1x8x32xf32>,
    %81 = vector.extract_strided_slice %12 {offsets = [2, 0, 0], sizes = [1, 8, 128], strides = [1, 1, 1]} : vector<8x8x128xf32> to vector<1x8x128xf32>
    %82 = vector.shape_cast %81 : vector<1x8x128xf32> to vector<8x128xf32>
    %cst_26 = arith.constant dense<0.000000e+00> : vector<8x128xf32>
    %83 = tpu.matmul %77, %14, %cst_26 {dimension_numbers = #tpu.dot_dimension_numbers<[1], [0], [0], [1], [0, 0, 1, 1], [], []>} : vector<8x32xf32>, vector<32x128xf32>, vector<8x128xf32> -> vector<8x128xf32>
    %84 = arith.addf %82, %83 : vector<8x128xf32>
    %85 = vector.extract_strided_slice %84 {offsets = [0, 0], sizes = [8, 32], strides = [1, 1]} : vector<8x128xf32> to vector<8x32xf32>
    %86 = arith.negf %85 : vector<8x32xf32>
    %87 = math.exp %86 : vector<8x32xf32>
    %cst_27 = arith.constant 1.000000e+00 : f32
    %88 = vector.broadcast %cst_27 : f32 to vector<8x32xf32>
    %89 = arith.addf %88, %87 : vector<8x32xf32>
    %90 = arith.divf %88, %89 : vector<8x32xf32>
    %91 = vector.extract_strided_slice %84 {offsets = [0, 32], sizes = [8, 32], strides = [1, 1]} : vector<8x128xf32> to vector<8x32xf32>
    %92 = arith.negf %91 : vector<8x32xf32>
    %93 = math.exp %92 : vector<8x32xf32>
    %cst_28 = arith.constant 1.000000e+00 : f32
    %94 = vector.broadcast %cst_28 : f32 to vector<8x32xf32>
    %95 = arith.addf %94, %93 : vector<8x32xf32>
    %96 = arith.divf %94, %95 : vector<8x32xf32>
    %97 = vector.extract_strided_slice %84 {offsets = [0, 64], sizes = [8, 32], strides = [1, 1]} : vector<8x128xf32> to vector<8x32xf32>
    %98 = math.tanh %97 : vector<8x32xf32>
    %99 = vector.extract_strided_slice %84 {offsets = [0, 96], sizes = [8, 32], strides = [1, 1]} : vector<8x128xf32> to vector<8x32xf32>
    %100 = arith.negf %99 : vector<8x32xf32>
    %101 = math.exp %100 : vector<8x32xf32>
    %cst_29 = arith.constant 1.000000e+00 : f32
    %102 = vector.broadcast %cst_29 : f32 to vector<8x32xf32>
    %103 = arith.addf %102, %101 : vector<8x32xf32>
    %104 = arith.divf %102, %103 : vector<8x32xf32>
    %105 = arith.mulf %96, %75 : vector<8x32xf32>
    %106 = arith.mulf %90, %98 : vector<8x32xf32>
    %107 = arith.addf %105, %106 : vector<8x32xf32>
    %108 = math.tanh %107 : vector<8x32xf32>
    %109 = arith.mulf %104, %108 : vector<8x32xf32>
    %c2 = arith.constant 2 : index
    %c0_30 = arith.constant 0 : index
    %c0_31 = arith.constant 0 : index
    %110 = vector.load %arg5[%c2, %c0_30, %c0_31] : memref<8x8x32xf32, #tpu.memory_space<vmem>>, vector<1x8x32xf32>
    %111 = vector.shape_cast %110 : vector<1x8x32xf32> to vector<8x32xf32>
    %112 = vector.shape_cast %109 : vector<8x32xf32> to vector<1x8x32xf32>
    tpu.vector_store %arg5[%c2, %c0_30, %c0_31], %112 {strides = array<i32>} : memref<8x8x32xf32, #tpu.memory_space<vmem>>, vector<1x8x32xf32>,
    %113 = vector.extract_strided_slice %12 {offsets = [3, 0, 0], sizes = [1, 8, 128], strides = [1, 1, 1]} : vector<8x8x128xf32> to vector<1x8x128xf32>
    %114 = vector.shape_cast %113 : vector<1x8x128xf32> to vector<8x128xf32>
    %cst_32 = arith.constant dense<0.000000e+00> : vector<8x128xf32>
    %115 = tpu.matmul %109, %14, %cst_32 {dimension_numbers = #tpu.dot_dimension_numbers<[1], [0], [0], [1], [0, 0, 1, 1], [], []>} : vector<8x32xf32>, vector<32x128xf32>, vector<8x128xf32> -> vector<8x128xf32>
    %116 = arith.addf %114, %115 : vector<8x128xf32>
    %117 = vector.extract_strided_slice %116 {offsets = [0, 0], sizes = [8, 32], strides = [1, 1]} : vector<8x128xf32> to vector<8x32xf32>
    %118 = arith.negf %117 : vector<8x32xf32>
    %119 = math.exp %118 : vector<8x32xf32>
    %cst_33 = arith.constant 1.000000e+00 : f32
    %120 = vector.broadcast %cst_33 : f32 to vector<8x32xf32>
    %121 = arith.addf %120, %119 : vector<8x32xf32>
    %122 = arith.divf %120, %121 : vector<8x32xf32>
    %123 = vector.extract_strided_slice %116 {offsets = [0, 32], sizes = [8, 32], strides = [1, 1]} : vector<8x128xf32> to vector<8x32xf32>
    %124 = arith.negf %123 : vector<8x32xf32>
    %125 = math.exp %124 : vector<8x32xf32>
    %cst_34 = arith.constant 1.000000e+00 : f32
    %126 = vector.broadcast %cst_34 : f32 to vector<8x32xf32>
    %127 = arith.addf %126, %125 : vector<8x32xf32>
    %128 = arith.divf %126, %127 : vector<8x32xf32>
    %129 = vector.extract_strided_slice %116 {offsets = [0, 64], sizes = [8, 32], strides = [1, 1]} : vector<8x128xf32> to vector<8x32xf32>
    %130 = math.tanh %129 : vector<8x32xf32>
    %131 = vector.extract_strided_slice %116 {offsets = [0, 96], sizes = [8, 32], strides = [1, 1]} : vector<8x128xf32> to vector<8x32xf32>
    %132 = arith.negf %131 : vector<8x32xf32>
    %133 = math.exp %132 : vector<8x32xf32>
    %cst_35 = arith.constant 1.000000e+00 : f32
    %134 = vector.broadcast %cst_35 : f32 to vector<8x32xf32>
    %135 = arith.addf %134, %133 : vector<8x32xf32>
    %136 = arith.divf %134, %135 : vector<8x32xf32>
    %137 = arith.mulf %128, %107 : vector<8x32xf32>
    %138 = arith.mulf %122, %130 : vector<8x32xf32>
    %139 = arith.addf %137, %138 : vector<8x32xf32>
    %140 = math.tanh %139 : vector<8x32xf32>
    %141 = arith.mulf %136, %140 : vector<8x32xf32>
    %c3 = arith.constant 3 : index
    %c0_36 = arith.constant 0 : index
    %c0_37 = arith.constant 0 : index
    %142 = vector.load %arg5[%c3, %c0_36, %c0_37] : memref<8x8x32xf32, #tpu.memory_space<vmem>>, vector<1x8x32xf32>
    %143 = vector.shape_cast %142 : vector<1x8x32xf32> to vector<8x32xf32>
    %144 = vector.shape_cast %141 : vector<8x32xf32> to vector<1x8x32xf32>
    tpu.vector_store %arg5[%c3, %c0_36, %c0_37], %144 {strides = array<i32>} : memref<8x8x32xf32, #tpu.memory_space<vmem>>, vector<1x8x32xf32>,
    %145 = vector.extract_strided_slice %12 {offsets = [4, 0, 0], sizes = [1, 8, 128], strides = [1, 1, 1]} : vector<8x8x128xf32> to vector<1x8x128xf32>
    %146 = vector.shape_cast %145 : vector<1x8x128xf32> to vector<8x128xf32>
    %cst_38 = arith.constant dense<0.000000e+00> : vector<8x128xf32>
    %147 = tpu.matmul %141, %14, %cst_38 {dimension_numbers = #tpu.dot_dimension_numbers<[1], [0], [0], [1], [0, 0, 1, 1], [], []>} : vector<8x32xf32>, vector<32x128xf32>, vector<8x128xf32> -> vector<8x128xf32>
    %148 = arith.addf %146, %147 : vector<8x128xf32>
    %149 = vector.extract_strided_slice %148 {offsets = [0, 0], sizes = [8, 32], strides = [1, 1]} : vector<8x128xf32> to vector<8x32xf32>
    %150 = arith.negf %149 : vector<8x32xf32>
    %151 = math.exp %150 : vector<8x32xf32>
    %cst_39 = arith.constant 1.000000e+00 : f32
    %152 = vector.broadcast %cst_39 : f32 to vector<8x32xf32>
    %153 = arith.addf %152, %151 : vector<8x32xf32>
    %154 = arith.divf %152, %153 : vector<8x32xf32>
    %155 = vector.extract_strided_slice %148 {offsets = [0, 32], sizes = [8, 32], strides = [1, 1]} : vector<8x128xf32> to vector<8x32xf32>
    %156 = arith.negf %155 : vector<8x32xf32>
    %157 = math.exp %156 : vector<8x32xf32>
    %cst_40 = arith.constant 1.000000e+00 : f32
    %158 = vector.broadcast %cst_40 : f32 to vector<8x32xf32>
    %159 = arith.addf %158, %157 : vector<8x32xf32>
    %160 = arith.divf %158, %159 : vector<8x32xf32>
    %161 = vector.extract_strided_slice %148 {offsets = [0, 64], sizes = [8, 32], strides = [1, 1]} : vector<8x128xf32> to vector<8x32xf32>
    %162 = math.tanh %161 : vector<8x32xf32>
    %163 = vector.extract_strided_slice %148 {offsets = [0, 96], sizes = [8, 32], strides = [1, 1]} : vector<8x128xf32> to vector<8x32xf32>
    %164 = arith.negf %163 : vector<8x32xf32>
    %165 = math.exp %164 : vector<8x32xf32>
    %cst_41 = arith.constant 1.000000e+00 : f32
    %166 = vector.broadcast %cst_41 : f32 to vector<8x32xf32>
    %167 = arith.addf %166, %165 : vector<8x32xf32>
    %168 = arith.divf %166, %167 : vector<8x32xf32>
    %169 = arith.mulf %160, %139 : vector<8x32xf32>
    %170 = arith.mulf %154, %162 : vector<8x32xf32>
    %171 = arith.addf %169, %170 : vector<8x32xf32>
    %172 = math.tanh %171 : vector<8x32xf32>
    %173 = arith.mulf %168, %172 : vector<8x32xf32>
    %c4 = arith.constant 4 : index
    %c0_42 = arith.constant 0 : index
    %c0_43 = arith.constant 0 : index
    %174 = vector.load %arg5[%c4, %c0_42, %c0_43] : memref<8x8x32xf32, #tpu.memory_space<vmem>>, vector<1x8x32xf32>
    %175 = vector.shape_cast %174 : vector<1x8x32xf32> to vector<8x32xf32>
    %176 = vector.shape_cast %173 : vector<8x32xf32> to vector<1x8x32xf32>
    tpu.vector_store %arg5[%c4, %c0_42, %c0_43], %176 {strides = array<i32>} : memref<8x8x32xf32, #tpu.memory_space<vmem>>, vector<1x8x32xf32>,
    %177 = vector.extract_strided_slice %12 {offsets = [5, 0, 0], sizes = [1, 8, 128], strides = [1, 1, 1]} : vector<8x8x128xf32> to vector<1x8x128xf32>
    %178 = vector.shape_cast %177 : vector<1x8x128xf32> to vector<8x128xf32>
    %cst_44 = arith.constant dense<0.000000e+00> : vector<8x128xf32>
    %179 = tpu.matmul %173, %14, %cst_44 {dimension_numbers = #tpu.dot_dimension_numbers<[1], [0], [0], [1], [0, 0, 1, 1], [], []>} : vector<8x32xf32>, vector<32x128xf32>, vector<8x128xf32> -> vector<8x128xf32>
    %180 = arith.addf %178, %179 : vector<8x128xf32>
    %181 = vector.extract_strided_slice %180 {offsets = [0, 0], sizes = [8, 32], strides = [1, 1]} : vector<8x128xf32> to vector<8x32xf32>
    %182 = arith.negf %181 : vector<8x32xf32>
    %183 = math.exp %182 : vector<8x32xf32>
    %cst_45 = arith.constant 1.000000e+00 : f32
    %184 = vector.broadcast %cst_45 : f32 to vector<8x32xf32>
    %185 = arith.addf %184, %183 : vector<8x32xf32>
    %186 = arith.divf %184, %185 : vector<8x32xf32>
    %187 = vector.extract_strided_slice %180 {offsets = [0, 32], sizes = [8, 32], strides = [1, 1]} : vector<8x128xf32> to vector<8x32xf32>
    %188 = arith.negf %187 : vector<8x32xf32>
    %189 = math.exp %188 : vector<8x32xf32>
    %cst_46 = arith.constant 1.000000e+00 : f32
    %190 = vector.broadcast %cst_46 : f32 to vector<8x32xf32>
    %191 = arith.addf %190, %189 : vector<8x32xf32>
    %192 = arith.divf %190, %191 : vector<8x32xf32>
    %193 = vector.extract_strided_slice %180 {offsets = [0, 64], sizes = [8, 32], strides = [1, 1]} : vector<8x128xf32> to vector<8x32xf32>
    %194 = math.tanh %193 : vector<8x32xf32>
    %195 = vector.extract_strided_slice %180 {offsets = [0, 96], sizes = [8, 32], strides = [1, 1]} : vector<8x128xf32> to vector<8x32xf32>
    %196 = arith.negf %195 : vector<8x32xf32>
    %197 = math.exp %196 : vector<8x32xf32>
    %cst_47 = arith.constant 1.000000e+00 : f32
    %198 = vector.broadcast %cst_47 : f32 to vector<8x32xf32>
    %199 = arith.addf %198, %197 : vector<8x32xf32>
    %200 = arith.divf %198, %199 : vector<8x32xf32>
    %201 = arith.mulf %192, %171 : vector<8x32xf32>
    %202 = arith.mulf %186, %194 : vector<8x32xf32>
    %203 = arith.addf %201, %202 : vector<8x32xf32>
    %204 = math.tanh %203 : vector<8x32xf32>
    %205 = arith.mulf %200, %204 : vector<8x32xf32>
    %c5 = arith.constant 5 : index
    %c0_48 = arith.constant 0 : index
    %c0_49 = arith.constant 0 : index
    %206 = vector.load %arg5[%c5, %c0_48, %c0_49] : memref<8x8x32xf32, #tpu.memory_space<vmem>>, vector<1x8x32xf32>
    %207 = vector.shape_cast %206 : vector<1x8x32xf32> to vector<8x32xf32>
    %208 = vector.shape_cast %205 : vector<8x32xf32> to vector<1x8x32xf32>
    tpu.vector_store %arg5[%c5, %c0_48, %c0_49], %208 {strides = array<i32>} : memref<8x8x32xf32, #tpu.memory_space<vmem>>, vector<1x8x32xf32>,
    %209 = vector.extract_strided_slice %12 {offsets = [6, 0, 0], sizes = [1, 8, 128], strides = [1, 1, 1]} : vector<8x8x128xf32> to vector<1x8x128xf32>
    %210 = vector.shape_cast %209 : vector<1x8x128xf32> to vector<8x128xf32>
    %cst_50 = arith.constant dense<0.000000e+00> : vector<8x128xf32>
    %211 = tpu.matmul %205, %14, %cst_50 {dimension_numbers = #tpu.dot_dimension_numbers<[1], [0], [0], [1], [0, 0, 1, 1], [], []>} : vector<8x32xf32>, vector<32x128xf32>, vector<8x128xf32> -> vector<8x128xf32>
    %212 = arith.addf %210, %211 : vector<8x128xf32>
    %213 = vector.extract_strided_slice %212 {offsets = [0, 0], sizes = [8, 32], strides = [1, 1]} : vector<8x128xf32> to vector<8x32xf32>
    %214 = arith.negf %213 : vector<8x32xf32>
    %215 = math.exp %214 : vector<8x32xf32>
    %cst_51 = arith.constant 1.000000e+00 : f32
    %216 = vector.broadcast %cst_51 : f32 to vector<8x32xf32>
    %217 = arith.addf %216, %215 : vector<8x32xf32>
    %218 = arith.divf %216, %217 : vector<8x32xf32>
    %219 = vector.extract_strided_slice %212 {offsets = [0, 32], sizes = [8, 32], strides = [1, 1]} : vector<8x128xf32> to vector<8x32xf32>
    %220 = arith.negf %219 : vector<8x32xf32>
    %221 = math.exp %220 : vector<8x32xf32>
    %cst_52 = arith.constant 1.000000e+00 : f32
    %222 = vector.broadcast %cst_52 : f32 to vector<8x32xf32>
    %223 = arith.addf %222, %221 : vector<8x32xf32>
    %224 = arith.divf %222, %223 : vector<8x32xf32>
    %225 = vector.extract_strided_slice %212 {offsets = [0, 64], sizes = [8, 32], strides = [1, 1]} : vector<8x128xf32> to vector<8x32xf32>
    %226 = math.tanh %225 : vector<8x32xf32>
    %227 = vector.extract_strided_slice %212 {offsets = [0, 96], sizes = [8, 32], strides = [1, 1]} : vector<8x128xf32> to vector<8x32xf32>
    %228 = arith.negf %227 : vector<8x32xf32>
    %229 = math.exp %228 : vector<8x32xf32>
    %cst_53 = arith.constant 1.000000e+00 : f32
    %230 = vector.broadcast %cst_53 : f32 to vector<8x32xf32>
    %231 = arith.addf %230, %229 : vector<8x32xf32>
    %232 = arith.divf %230, %231 : vector<8x32xf32>
    %233 = arith.mulf %224, %203 : vector<8x32xf32>
    %234 = arith.mulf %218, %226 : vector<8x32xf32>
    %235 = arith.addf %233, %234 : vector<8x32xf32>
    %236 = math.tanh %235 : vector<8x32xf32>
    %237 = arith.mulf %232, %236 : vector<8x32xf32>
    %c6 = arith.constant 6 : index
    %c0_54 = arith.constant 0 : index
    %c0_55 = arith.constant 0 : index
    %238 = vector.load %arg5[%c6, %c0_54, %c0_55] : memref<8x8x32xf32, #tpu.memory_space<vmem>>, vector<1x8x32xf32>
    %239 = vector.shape_cast %238 : vector<1x8x32xf32> to vector<8x32xf32>
    %240 = vector.shape_cast %237 : vector<8x32xf32> to vector<1x8x32xf32>
    tpu.vector_store %arg5[%c6, %c0_54, %c0_55], %240 {strides = array<i32>} : memref<8x8x32xf32, #tpu.memory_space<vmem>>, vector<1x8x32xf32>,
    %241 = vector.extract_strided_slice %12 {offsets = [7, 0, 0], sizes = [1, 8, 128], strides = [1, 1, 1]} : vector<8x8x128xf32> to vector<1x8x128xf32>
    %242 = vector.shape_cast %241 : vector<1x8x128xf32> to vector<8x128xf32>
    %cst_56 = arith.constant dense<0.000000e+00> : vector<8x128xf32>
    %243 = tpu.matmul %237, %14, %cst_56 {dimension_numbers = #tpu.dot_dimension_numbers<[1], [0], [0], [1], [0, 0, 1, 1], [], []>} : vector<8x32xf32>, vector<32x128xf32>, vector<8x128xf32> -> vector<8x128xf32>
    %244 = arith.addf %242, %243 : vector<8x128xf32>
    %245 = vector.extract_strided_slice %244 {offsets = [0, 0], sizes = [8, 32], strides = [1, 1]} : vector<8x128xf32> to vector<8x32xf32>
    %246 = arith.negf %245 : vector<8x32xf32>
    %247 = math.exp %246 : vector<8x32xf32>
    %cst_57 = arith.constant 1.000000e+00 : f32
    %248 = vector.broadcast %cst_57 : f32 to vector<8x32xf32>
    %249 = arith.addf %248, %247 : vector<8x32xf32>
    %250 = arith.divf %248, %249 : vector<8x32xf32>
    %251 = vector.extract_strided_slice %244 {offsets = [0, 32], sizes = [8, 32], strides = [1, 1]} : vector<8x128xf32> to vector<8x32xf32>
    %252 = arith.negf %251 : vector<8x32xf32>
    %253 = math.exp %252 : vector<8x32xf32>
    %cst_58 = arith.constant 1.000000e+00 : f32
    %254 = vector.broadcast %cst_58 : f32 to vector<8x32xf32>
    %255 = arith.addf %254, %253 : vector<8x32xf32>
    %256 = arith.divf %254, %255 : vector<8x32xf32>
    %257 = vector.extract_strided_slice %244 {offsets = [0, 64], sizes = [8, 32], strides = [1, 1]} : vector<8x128xf32> to vector<8x32xf32>
    %258 = math.tanh %257 : vector<8x32xf32>
    %259 = vector.extract_strided_slice %244 {offsets = [0, 96], sizes = [8, 32], strides = [1, 1]} : vector<8x128xf32> to vector<8x32xf32>
    %260 = arith.negf %259 : vector<8x32xf32>
    %261 = math.exp %260 : vector<8x32xf32>
    %cst_59 = arith.constant 1.000000e+00 : f32
    %262 = vector.broadcast %cst_59 : f32 to vector<8x32xf32>
    %263 = arith.addf %262, %261 : vector<8x32xf32>
    %264 = arith.divf %262, %263 : vector<8x32xf32>
    %265 = arith.mulf %256, %235 : vector<8x32xf32>
    %266 = arith.mulf %250, %258 : vector<8x32xf32>
    %267 = arith.addf %265, %266 : vector<8x32xf32>
    %268 = math.tanh %267 : vector<8x32xf32>
    %269 = arith.mulf %264, %268 : vector<8x32xf32>
    %c7 = arith.constant 7 : index
    %c0_60 = arith.constant 0 : index
    %c0_61 = arith.constant 0 : index
    %270 = vector.load %arg5[%c7, %c0_60, %c0_61] : memref<8x8x32xf32, #tpu.memory_space<vmem>>, vector<1x8x32xf32>
    %271 = vector.shape_cast %270 : vector<1x8x32xf32> to vector<8x32xf32>
    %272 = vector.shape_cast %269 : vector<8x32xf32> to vector<1x8x32xf32>
    tpu.vector_store %arg5[%c7, %c0_60, %c0_61], %272 {strides = array<i32>} : memref<8x8x32xf32, #tpu.memory_space<vmem>>, vector<1x8x32xf32>,
    %c8 = arith.constant 8 : index
    %c0_62 = arith.constant 0 : index
    %c0_63 = arith.constant 0 : index
    %273 = vector.load %arg4[%c8, %c0_62, %c0_63] : memref<12x8x32xf32, #tpu.memory_space<vmem>>, vector<1x8x32xf32>
    %274 = vector.shape_cast %273 : vector<1x8x32xf32> to vector<8x32xf32>
    %275 = vector.shape_cast %269 : vector<8x32xf32> to vector<1x8x32xf32>
    tpu.vector_store %arg4[%c8, %c0_62, %c0_63], %275 {strides = array<i32>} : memref<12x8x32xf32, #tpu.memory_space<vmem>>, vector<1x8x32xf32>,
    %c10 = arith.constant 10 : index
    %c0_64 = arith.constant 0 : index
    %c0_65 = arith.constant 0 : index
    %276 = vector.load %arg4[%c10, %c0_64, %c0_65] : memref<12x8x32xf32, #tpu.memory_space<vmem>>, vector<1x8x32xf32>
    %277 = vector.shape_cast %276 : vector<1x8x32xf32> to vector<8x32xf32>
    %278 = vector.shape_cast %267 : vector<8x32xf32> to vector<1x8x32xf32>
    tpu.vector_store %arg4[%c10, %c0_64, %c0_65], %278 {strides = array<i32>} : memref<12x8x32xf32, #tpu.memory_space<vmem>>, vector<1x8x32xf32>,
    %c0_66 = arith.constant 0 : index
    %c0_67 = arith.constant 0 : index
    %c0_68 = arith.constant 0 : index
    %279 = vector.load %arg5[%c0_66, %c0_67, %c0_68] : memref<8x8x32xf32, #tpu.memory_space<vmem>>, vector<8x8x32xf32>
    %280 = vector.shape_cast %279 : vector<8x8x32xf32> to vector<64x32xf32>
    %281 = vector.extract_strided_slice %0 {offsets = [1, 0, 0], sizes = [1, 32, 128], strides = [1, 1, 1]} : vector<2x32x128xf32> to vector<1x32x128xf32>
    %282 = vector.shape_cast %281 : vector<1x32x128xf32> to vector<32x128xf32>
    %cst_69 = arith.constant dense<0.000000e+00> : vector<64x128xf32>
    %283 = tpu.matmul %280, %282, %cst_69 {dimension_numbers = #tpu.dot_dimension_numbers<[1], [0], [0], [1], [0, 0, 1, 1], [], []>} : vector<64x32xf32>, vector<32x128xf32>, vector<64x128xf32> -> vector<64x128xf32>
    %284 = vector.extract_strided_slice %2 {offsets = [1, 0, 0], sizes = [1, 1, 128], strides = [1, 1, 1]} : vector<2x1x128xf32> to vector<1x1x128xf32>
    %285 = vector.shape_cast %284 : vector<1x1x128xf32> to vector<1x128xf32>
    %286 = vector.broadcast %285 : vector<1x128xf32> to vector<64x128xf32>
    %287 = arith.addf %283, %286 : vector<64x128xf32>
    %288 = vector.shape_cast %287 : vector<64x128xf32> to vector<8x8x128xf32>
    %289 = vector.extract_strided_slice %1 {offsets = [1, 0, 0], sizes = [1, 32, 128], strides = [1, 1, 1]} : vector<2x32x128xf32> to vector<1x32x128xf32>
    %290 = vector.shape_cast %289 : vector<1x32x128xf32> to vector<32x128xf32>
    %cst_70 = arith.constant 0.000000e+00 : f32
    %291 = vector.broadcast %cst_70 : f32 to vector<8x32xf32>
    %cst_71 = arith.constant 0.000000e+00 : f32
    %292 = vector.broadcast %cst_71 : f32 to vector<8x32xf32>
    %293 = vector.extract_strided_slice %288 {offsets = [0, 0, 0], sizes = [1, 8, 128], strides = [1, 1, 1]} : vector<8x8x128xf32> to vector<1x8x128xf32>
    %294 = vector.shape_cast %293 : vector<1x8x128xf32> to vector<8x128xf32>
    %cst_72 = arith.constant dense<0.000000e+00> : vector<8x128xf32>
    %295 = tpu.matmul %291, %290, %cst_72 {dimension_numbers = #tpu.dot_dimension_numbers<[1], [0], [0], [1], [0, 0, 1, 1], [], []>} : vector<8x32xf32>, vector<32x128xf32>, vector<8x128xf32> -> vector<8x128xf32>
    %296 = arith.addf %294, %295 : vector<8x128xf32>
    %297 = vector.extract_strided_slice %296 {offsets = [0, 0], sizes = [8, 32], strides = [1, 1]} : vector<8x128xf32> to vector<8x32xf32>
    %298 = arith.negf %297 : vector<8x32xf32>
    %299 = math.exp %298 : vector<8x32xf32>
    %cst_73 = arith.constant 1.000000e+00 : f32
    %300 = vector.broadcast %cst_73 : f32 to vector<8x32xf32>
    %301 = arith.addf %300, %299 : vector<8x32xf32>
    %302 = arith.divf %300, %301 : vector<8x32xf32>
    %303 = vector.extract_strided_slice %296 {offsets = [0, 32], sizes = [8, 32], strides = [1, 1]} : vector<8x128xf32> to vector<8x32xf32>
    %304 = arith.negf %303 : vector<8x32xf32>
    %305 = math.exp %304 : vector<8x32xf32>
    %cst_74 = arith.constant 1.000000e+00 : f32
    %306 = vector.broadcast %cst_74 : f32 to vector<8x32xf32>
    %307 = arith.addf %306, %305 : vector<8x32xf32>
    %308 = arith.divf %306, %307 : vector<8x32xf32>
    %309 = vector.extract_strided_slice %296 {offsets = [0, 64], sizes = [8, 32], strides = [1, 1]} : vector<8x128xf32> to vector<8x32xf32>
    %310 = math.tanh %309 : vector<8x32xf32>
    %311 = vector.extract_strided_slice %296 {offsets = [0, 96], sizes = [8, 32], strides = [1, 1]} : vector<8x128xf32> to vector<8x32xf32>
    %312 = arith.negf %311 : vector<8x32xf32>
    %313 = math.exp %312 : vector<8x32xf32>
    %cst_75 = arith.constant 1.000000e+00 : f32
    %314 = vector.broadcast %cst_75 : f32 to vector<8x32xf32>
    %315 = arith.addf %314, %313 : vector<8x32xf32>
    %316 = arith.divf %314, %315 : vector<8x32xf32>
    %317 = arith.mulf %308, %292 : vector<8x32xf32>
    %318 = arith.mulf %302, %310 : vector<8x32xf32>
    %319 = arith.addf %317, %318 : vector<8x32xf32>
    %320 = math.tanh %319 : vector<8x32xf32>
    %321 = arith.mulf %316, %320 : vector<8x32xf32>
    %c0_76 = arith.constant 0 : index
    %c0_77 = arith.constant 0 : index
    %c0_78 = arith.constant 0 : index
    %322 = vector.load %arg4[%c0_76, %c0_77, %c0_78] : memref<12x8x32xf32, #tpu.memory_space<vmem>>, vector<1x8x32xf32>
    %323 = vector.shape_cast %322 : vector<1x8x32xf32> to vector<8x32xf32>
    %324 = vector.shape_cast %321 : vector<8x32xf32> to vector<1x8x32xf32>
    tpu.vector_store %arg4[%c0_76, %c0_77, %c0_78], %324 {strides = array<i32>} : memref<12x8x32xf32, #tpu.memory_space<vmem>>, vector<1x8x32xf32>,
    %325 = vector.extract_strided_slice %288 {offsets = [1, 0, 0], sizes = [1, 8, 128], strides = [1, 1, 1]} : vector<8x8x128xf32> to vector<1x8x128xf32>
    %326 = vector.shape_cast %325 : vector<1x8x128xf32> to vector<8x128xf32>
    %cst_79 = arith.constant dense<0.000000e+00> : vector<8x128xf32>
    %327 = tpu.matmul %321, %290, %cst_79 {dimension_numbers = #tpu.dot_dimension_numbers<[1], [0], [0], [1], [0, 0, 1, 1], [], []>} : vector<8x32xf32>, vector<32x128xf32>, vector<8x128xf32> -> vector<8x128xf32>
    %328 = arith.addf %326, %327 : vector<8x128xf32>
    %329 = vector.extract_strided_slice %328 {offsets = [0, 0], sizes = [8, 32], strides = [1, 1]} : vector<8x128xf32> to vector<8x32xf32>
    %330 = arith.negf %329 : vector<8x32xf32>
    %331 = math.exp %330 : vector<8x32xf32>
    %cst_80 = arith.constant 1.000000e+00 : f32
    %332 = vector.broadcast %cst_80 : f32 to vector<8x32xf32>
    %333 = arith.addf %332, %331 : vector<8x32xf32>
    %334 = arith.divf %332, %333 : vector<8x32xf32>
    %335 = vector.extract_strided_slice %328 {offsets = [0, 32], sizes = [8, 32], strides = [1, 1]} : vector<8x128xf32> to vector<8x32xf32>
    %336 = arith.negf %335 : vector<8x32xf32>
    %337 = math.exp %336 : vector<8x32xf32>
    %cst_81 = arith.constant 1.000000e+00 : f32
    %338 = vector.broadcast %cst_81 : f32 to vector<8x32xf32>
    %339 = arith.addf %338, %337 : vector<8x32xf32>
    %340 = arith.divf %338, %339 : vector<8x32xf32>
    %341 = vector.extract_strided_slice %328 {offsets = [0, 64], sizes = [8, 32], strides = [1, 1]} : vector<8x128xf32> to vector<8x32xf32>
    %342 = math.tanh %341 : vector<8x32xf32>
    %343 = vector.extract_strided_slice %328 {offsets = [0, 96], sizes = [8, 32], strides = [1, 1]} : vector<8x128xf32> to vector<8x32xf32>
    %344 = arith.negf %343 : vector<8x32xf32>
    %345 = math.exp %344 : vector<8x32xf32>
    %cst_82 = arith.constant 1.000000e+00 : f32
    %346 = vector.broadcast %cst_82 : f32 to vector<8x32xf32>
    %347 = arith.addf %346, %345 : vector<8x32xf32>
    %348 = arith.divf %346, %347 : vector<8x32xf32>
    %349 = arith.mulf %340, %319 : vector<8x32xf32>
    %350 = arith.mulf %334, %342 : vector<8x32xf32>
    %351 = arith.addf %349, %350 : vector<8x32xf32>
    %352 = math.tanh %351 : vector<8x32xf32>
    %353 = arith.mulf %348, %352 : vector<8x32xf32>
    %c1_83 = arith.constant 1 : index
    %c0_84 = arith.constant 0 : index
    %c0_85 = arith.constant 0 : index
    %354 = vector.load %arg4[%c1_83, %c0_84, %c0_85] : memref<12x8x32xf32, #tpu.memory_space<vmem>>, vector<1x8x32xf32>
    %355 = vector.shape_cast %354 : vector<1x8x32xf32> to vector<8x32xf32>
    %356 = vector.shape_cast %353 : vector<8x32xf32> to vector<1x8x32xf32>
    tpu.vector_store %arg4[%c1_83, %c0_84, %c0_85], %356 {strides = array<i32>} : memref<12x8x32xf32, #tpu.memory_space<vmem>>, vector<1x8x32xf32>,
    %357 = vector.extract_strided_slice %288 {offsets = [2, 0, 0], sizes = [1, 8, 128], strides = [1, 1, 1]} : vector<8x8x128xf32> to vector<1x8x128xf32>
    %358 = vector.shape_cast %357 : vector<1x8x128xf32> to vector<8x128xf32>
    %cst_86 = arith.constant dense<0.000000e+00> : vector<8x128xf32>
    %359 = tpu.matmul %353, %290, %cst_86 {dimension_numbers = #tpu.dot_dimension_numbers<[1], [0], [0], [1], [0, 0, 1, 1], [], []>} : vector<8x32xf32>, vector<32x128xf32>, vector<8x128xf32> -> vector<8x128xf32>
    %360 = arith.addf %358, %359 : vector<8x128xf32>
    %361 = vector.extract_strided_slice %360 {offsets = [0, 0], sizes = [8, 32], strides = [1, 1]} : vector<8x128xf32> to vector<8x32xf32>
    %362 = arith.negf %361 : vector<8x32xf32>
    %363 = math.exp %362 : vector<8x32xf32>
    %cst_87 = arith.constant 1.000000e+00 : f32
    %364 = vector.broadcast %cst_87 : f32 to vector<8x32xf32>
    %365 = arith.addf %364, %363 : vector<8x32xf32>
    %366 = arith.divf %364, %365 : vector<8x32xf32>
    %367 = vector.extract_strided_slice %360 {offsets = [0, 32], sizes = [8, 32], strides = [1, 1]} : vector<8x128xf32> to vector<8x32xf32>
    %368 = arith.negf %367 : vector<8x32xf32>
    %369 = math.exp %368 : vector<8x32xf32>
    %cst_88 = arith.constant 1.000000e+00 : f32
    %370 = vector.broadcast %cst_88 : f32 to vector<8x32xf32>
    %371 = arith.addf %370, %369 : vector<8x32xf32>
    %372 = arith.divf %370, %371 : vector<8x32xf32>
    %373 = vector.extract_strided_slice %360 {offsets = [0, 64], sizes = [8, 32], strides = [1, 1]} : vector<8x128xf32> to vector<8x32xf32>
    %374 = math.tanh %373 : vector<8x32xf32>
    %375 = vector.extract_strided_slice %360 {offsets = [0, 96], sizes = [8, 32], strides = [1, 1]} : vector<8x128xf32> to vector<8x32xf32>
    %376 = arith.negf %375 : vector<8x32xf32>
    %377 = math.exp %376 : vector<8x32xf32>
    %cst_89 = arith.constant 1.000000e+00 : f32
    %378 = vector.broadcast %cst_89 : f32 to vector<8x32xf32>
    %379 = arith.addf %378, %377 : vector<8x32xf32>
    %380 = arith.divf %378, %379 : vector<8x32xf32>
    %381 = arith.mulf %372, %351 : vector<8x32xf32>
    %382 = arith.mulf %366, %374 : vector<8x32xf32>
    %383 = arith.addf %381, %382 : vector<8x32xf32>
    %384 = math.tanh %383 : vector<8x32xf32>
    %385 = arith.mulf %380, %384 : vector<8x32xf32>
    %c2_90 = arith.constant 2 : index
    %c0_91 = arith.constant 0 : index
    %c0_92 = arith.constant 0 : index
    %386 = vector.load %arg4[%c2_90, %c0_91, %c0_92] : memref<12x8x32xf32, #tpu.memory_space<vmem>>, vector<1x8x32xf32>
    %387 = vector.shape_cast %386 : vector<1x8x32xf32> to vector<8x32xf32>
    %388 = vector.shape_cast %385 : vector<8x32xf32> to vector<1x8x32xf32>
    tpu.vector_store %arg4[%c2_90, %c0_91, %c0_92], %388 {strides = array<i32>} : memref<12x8x32xf32, #tpu.memory_space<vmem>>, vector<1x8x32xf32>,
    %389 = vector.extract_strided_slice %288 {offsets = [3, 0, 0], sizes = [1, 8, 128], strides = [1, 1, 1]} : vector<8x8x128xf32> to vector<1x8x128xf32>
    %390 = vector.shape_cast %389 : vector<1x8x128xf32> to vector<8x128xf32>
    %cst_93 = arith.constant dense<0.000000e+00> : vector<8x128xf32>
    %391 = tpu.matmul %385, %290, %cst_93 {dimension_numbers = #tpu.dot_dimension_numbers<[1], [0], [0], [1], [0, 0, 1, 1], [], []>} : vector<8x32xf32>, vector<32x128xf32>, vector<8x128xf32> -> vector<8x128xf32>
    %392 = arith.addf %390, %391 : vector<8x128xf32>
    %393 = vector.extract_strided_slice %392 {offsets = [0, 0], sizes = [8, 32], strides = [1, 1]} : vector<8x128xf32> to vector<8x32xf32>
    %394 = arith.negf %393 : vector<8x32xf32>
    %395 = math.exp %394 : vector<8x32xf32>
    %cst_94 = arith.constant 1.000000e+00 : f32
    %396 = vector.broadcast %cst_94 : f32 to vector<8x32xf32>
    %397 = arith.addf %396, %395 : vector<8x32xf32>
    %398 = arith.divf %396, %397 : vector<8x32xf32>
    %399 = vector.extract_strided_slice %392 {offsets = [0, 32], sizes = [8, 32], strides = [1, 1]} : vector<8x128xf32> to vector<8x32xf32>
    %400 = arith.negf %399 : vector<8x32xf32>
    %401 = math.exp %400 : vector<8x32xf32>
    %cst_95 = arith.constant 1.000000e+00 : f32
    %402 = vector.broadcast %cst_95 : f32 to vector<8x32xf32>
    %403 = arith.addf %402, %401 : vector<8x32xf32>
    %404 = arith.divf %402, %403 : vector<8x32xf32>
    %405 = vector.extract_strided_slice %392 {offsets = [0, 64], sizes = [8, 32], strides = [1, 1]} : vector<8x128xf32> to vector<8x32xf32>
    %406 = math.tanh %405 : vector<8x32xf32>
    %407 = vector.extract_strided_slice %392 {offsets = [0, 96], sizes = [8, 32], strides = [1, 1]} : vector<8x128xf32> to vector<8x32xf32>
    %408 = arith.negf %407 : vector<8x32xf32>
    %409 = math.exp %408 : vector<8x32xf32>
    %cst_96 = arith.constant 1.000000e+00 : f32
    %410 = vector.broadcast %cst_96 : f32 to vector<8x32xf32>
    %411 = arith.addf %410, %409 : vector<8x32xf32>
    %412 = arith.divf %410, %411 : vector<8x32xf32>
    %413 = arith.mulf %404, %383 : vector<8x32xf32>
    %414 = arith.mulf %398, %406 : vector<8x32xf32>
    %415 = arith.addf %413, %414 : vector<8x32xf32>
    %416 = math.tanh %415 : vector<8x32xf32>
    %417 = arith.mulf %412, %416 : vector<8x32xf32>
    %c3_97 = arith.constant 3 : index
    %c0_98 = arith.constant 0 : index
    %c0_99 = arith.constant 0 : index
    %418 = vector.load %arg4[%c3_97, %c0_98, %c0_99] : memref<12x8x32xf32, #tpu.memory_space<vmem>>, vector<1x8x32xf32>
    %419 = vector.shape_cast %418 : vector<1x8x32xf32> to vector<8x32xf32>
    %420 = vector.shape_cast %417 : vector<8x32xf32> to vector<1x8x32xf32>
    tpu.vector_store %arg4[%c3_97, %c0_98, %c0_99], %420 {strides = array<i32>} : memref<12x8x32xf32, #tpu.memory_space<vmem>>, vector<1x8x32xf32>,
    %421 = vector.extract_strided_slice %288 {offsets = [4, 0, 0], sizes = [1, 8, 128], strides = [1, 1, 1]} : vector<8x8x128xf32> to vector<1x8x128xf32>
    %422 = vector.shape_cast %421 : vector<1x8x128xf32> to vector<8x128xf32>
    %cst_100 = arith.constant dense<0.000000e+00> : vector<8x128xf32>
    %423 = tpu.matmul %417, %290, %cst_100 {dimension_numbers = #tpu.dot_dimension_numbers<[1], [0], [0], [1], [0, 0, 1, 1], [], []>} : vector<8x32xf32>, vector<32x128xf32>, vector<8x128xf32> -> vector<8x128xf32>
    %424 = arith.addf %422, %423 : vector<8x128xf32>
    %425 = vector.extract_strided_slice %424 {offsets = [0, 0], sizes = [8, 32], strides = [1, 1]} : vector<8x128xf32> to vector<8x32xf32>
    %426 = arith.negf %425 : vector<8x32xf32>
    %427 = math.exp %426 : vector<8x32xf32>
    %cst_101 = arith.constant 1.000000e+00 : f32
    %428 = vector.broadcast %cst_101 : f32 to vector<8x32xf32>
    %429 = arith.addf %428, %427 : vector<8x32xf32>
    %430 = arith.divf %428, %429 : vector<8x32xf32>
    %431 = vector.extract_strided_slice %424 {offsets = [0, 32], sizes = [8, 32], strides = [1, 1]} : vector<8x128xf32> to vector<8x32xf32>
    %432 = arith.negf %431 : vector<8x32xf32>
    %433 = math.exp %432 : vector<8x32xf32>
    %cst_102 = arith.constant 1.000000e+00 : f32
    %434 = vector.broadcast %cst_102 : f32 to vector<8x32xf32>
    %435 = arith.addf %434, %433 : vector<8x32xf32>
    %436 = arith.divf %434, %435 : vector<8x32xf32>
    %437 = vector.extract_strided_slice %424 {offsets = [0, 64], sizes = [8, 32], strides = [1, 1]} : vector<8x128xf32> to vector<8x32xf32>
    %438 = math.tanh %437 : vector<8x32xf32>
    %439 = vector.extract_strided_slice %424 {offsets = [0, 96], sizes = [8, 32], strides = [1, 1]} : vector<8x128xf32> to vector<8x32xf32>
    %440 = arith.negf %439 : vector<8x32xf32>
    %441 = math.exp %440 : vector<8x32xf32>
    %cst_103 = arith.constant 1.000000e+00 : f32
    %442 = vector.broadcast %cst_103 : f32 to vector<8x32xf32>
    %443 = arith.addf %442, %441 : vector<8x32xf32>
    %444 = arith.divf %442, %443 : vector<8x32xf32>
    %445 = arith.mulf %436, %415 : vector<8x32xf32>
    %446 = arith.mulf %430, %438 : vector<8x32xf32>
    %447 = arith.addf %445, %446 : vector<8x32xf32>
    %448 = math.tanh %447 : vector<8x32xf32>
    %449 = arith.mulf %444, %448 : vector<8x32xf32>
    %c4_104 = arith.constant 4 : index
    %c0_105 = arith.constant 0 : index
    %c0_106 = arith.constant 0 : index
    %450 = vector.load %arg4[%c4_104, %c0_105, %c0_106] : memref<12x8x32xf32, #tpu.memory_space<vmem>>, vector<1x8x32xf32>
    %451 = vector.shape_cast %450 : vector<1x8x32xf32> to vector<8x32xf32>
    %452 = vector.shape_cast %449 : vector<8x32xf32> to vector<1x8x32xf32>
    tpu.vector_store %arg4[%c4_104, %c0_105, %c0_106], %452 {strides = array<i32>} : memref<12x8x32xf32, #tpu.memory_space<vmem>>, vector<1x8x32xf32>,
    %453 = vector.extract_strided_slice %288 {offsets = [5, 0, 0], sizes = [1, 8, 128], strides = [1, 1, 1]} : vector<8x8x128xf32> to vector<1x8x128xf32>
    %454 = vector.shape_cast %453 : vector<1x8x128xf32> to vector<8x128xf32>
    %cst_107 = arith.constant dense<0.000000e+00> : vector<8x128xf32>
    %455 = tpu.matmul %449, %290, %cst_107 {dimension_numbers = #tpu.dot_dimension_numbers<[1], [0], [0], [1], [0, 0, 1, 1], [], []>} : vector<8x32xf32>, vector<32x128xf32>, vector<8x128xf32> -> vector<8x128xf32>
    %456 = arith.addf %454, %455 : vector<8x128xf32>
    %457 = vector.extract_strided_slice %456 {offsets = [0, 0], sizes = [8, 32], strides = [1, 1]} : vector<8x128xf32> to vector<8x32xf32>
    %458 = arith.negf %457 : vector<8x32xf32>
    %459 = math.exp %458 : vector<8x32xf32>
    %cst_108 = arith.constant 1.000000e+00 : f32
    %460 = vector.broadcast %cst_108 : f32 to vector<8x32xf32>
    %461 = arith.addf %460, %459 : vector<8x32xf32>
    %462 = arith.divf %460, %461 : vector<8x32xf32>
    %463 = vector.extract_strided_slice %456 {offsets = [0, 32], sizes = [8, 32], strides = [1, 1]} : vector<8x128xf32> to vector<8x32xf32>
    %464 = arith.negf %463 : vector<8x32xf32>
    %465 = math.exp %464 : vector<8x32xf32>
    %cst_109 = arith.constant 1.000000e+00 : f32
    %466 = vector.broadcast %cst_109 : f32 to vector<8x32xf32>
    %467 = arith.addf %466, %465 : vector<8x32xf32>
    %468 = arith.divf %466, %467 : vector<8x32xf32>
    %469 = vector.extract_strided_slice %456 {offsets = [0, 64], sizes = [8, 32], strides = [1, 1]} : vector<8x128xf32> to vector<8x32xf32>
    %470 = math.tanh %469 : vector<8x32xf32>
    %471 = vector.extract_strided_slice %456 {offsets = [0, 96], sizes = [8, 32], strides = [1, 1]} : vector<8x128xf32> to vector<8x32xf32>
    %472 = arith.negf %471 : vector<8x32xf32>
    %473 = math.exp %472 : vector<8x32xf32>
    %cst_110 = arith.constant 1.000000e+00 : f32
    %474 = vector.broadcast %cst_110 : f32 to vector<8x32xf32>
    %475 = arith.addf %474, %473 : vector<8x32xf32>
    %476 = arith.divf %474, %475 : vector<8x32xf32>
    %477 = arith.mulf %468, %447 : vector<8x32xf32>
    %478 = arith.mulf %462, %470 : vector<8x32xf32>
    %479 = arith.addf %477, %478 : vector<8x32xf32>
    %480 = math.tanh %479 : vector<8x32xf32>
    %481 = arith.mulf %476, %480 : vector<8x32xf32>
    %c5_111 = arith.constant 5 : index
    %c0_112 = arith.constant 0 : index
    %c0_113 = arith.constant 0 : index
    %482 = vector.load %arg4[%c5_111, %c0_112, %c0_113] : memref<12x8x32xf32, #tpu.memory_space<vmem>>, vector<1x8x32xf32>
    %483 = vector.shape_cast %482 : vector<1x8x32xf32> to vector<8x32xf32>
    %484 = vector.shape_cast %481 : vector<8x32xf32> to vector<1x8x32xf32>
    tpu.vector_store %arg4[%c5_111, %c0_112, %c0_113], %484 {strides = array<i32>} : memref<12x8x32xf32, #tpu.memory_space<vmem>>, vector<1x8x32xf32>,
    %485 = vector.extract_strided_slice %288 {offsets = [6, 0, 0], sizes = [1, 8, 128], strides = [1, 1, 1]} : vector<8x8x128xf32> to vector<1x8x128xf32>
    %486 = vector.shape_cast %485 : vector<1x8x128xf32> to vector<8x128xf32>
    %cst_114 = arith.constant dense<0.000000e+00> : vector<8x128xf32>
    %487 = tpu.matmul %481, %290, %cst_114 {dimension_numbers = #tpu.dot_dimension_numbers<[1], [0], [0], [1], [0, 0, 1, 1], [], []>} : vector<8x32xf32>, vector<32x128xf32>, vector<8x128xf32> -> vector<8x128xf32>
    %488 = arith.addf %486, %487 : vector<8x128xf32>
    %489 = vector.extract_strided_slice %488 {offsets = [0, 0], sizes = [8, 32], strides = [1, 1]} : vector<8x128xf32> to vector<8x32xf32>
    %490 = arith.negf %489 : vector<8x32xf32>
    %491 = math.exp %490 : vector<8x32xf32>
    %cst_115 = arith.constant 1.000000e+00 : f32
    %492 = vector.broadcast %cst_115 : f32 to vector<8x32xf32>
    %493 = arith.addf %492, %491 : vector<8x32xf32>
    %494 = arith.divf %492, %493 : vector<8x32xf32>
    %495 = vector.extract_strided_slice %488 {offsets = [0, 32], sizes = [8, 32], strides = [1, 1]} : vector<8x128xf32> to vector<8x32xf32>
    %496 = arith.negf %495 : vector<8x32xf32>
    %497 = math.exp %496 : vector<8x32xf32>
    %cst_116 = arith.constant 1.000000e+00 : f32
    %498 = vector.broadcast %cst_116 : f32 to vector<8x32xf32>
    %499 = arith.addf %498, %497 : vector<8x32xf32>
    %500 = arith.divf %498, %499 : vector<8x32xf32>
    %501 = vector.extract_strided_slice %488 {offsets = [0, 64], sizes = [8, 32], strides = [1, 1]} : vector<8x128xf32> to vector<8x32xf32>
    %502 = math.tanh %501 : vector<8x32xf32>
    %503 = vector.extract_strided_slice %488 {offsets = [0, 96], sizes = [8, 32], strides = [1, 1]} : vector<8x128xf32> to vector<8x32xf32>
    %504 = arith.negf %503 : vector<8x32xf32>
    %505 = math.exp %504 : vector<8x32xf32>
    %cst_117 = arith.constant 1.000000e+00 : f32
    %506 = vector.broadcast %cst_117 : f32 to vector<8x32xf32>
    %507 = arith.addf %506, %505 : vector<8x32xf32>
    %508 = arith.divf %506, %507 : vector<8x32xf32>
    %509 = arith.mulf %500, %479 : vector<8x32xf32>
    %510 = arith.mulf %494, %502 : vector<8x32xf32>
    %511 = arith.addf %509, %510 : vector<8x32xf32>
    %512 = math.tanh %511 : vector<8x32xf32>
    %513 = arith.mulf %508, %512 : vector<8x32xf32>
    %c6_118 = arith.constant 6 : index
    %c0_119 = arith.constant 0 : index
    %c0_120 = arith.constant 0 : index
    %514 = vector.load %arg4[%c6_118, %c0_119, %c0_120] : memref<12x8x32xf32, #tpu.memory_space<vmem>>, vector<1x8x32xf32>
    %515 = vector.shape_cast %514 : vector<1x8x32xf32> to vector<8x32xf32>
    %516 = vector.shape_cast %513 : vector<8x32xf32> to vector<1x8x32xf32>
    tpu.vector_store %arg4[%c6_118, %c0_119, %c0_120], %516 {strides = array<i32>} : memref<12x8x32xf32, #tpu.memory_space<vmem>>, vector<1x8x32xf32>,
    %517 = vector.extract_strided_slice %288 {offsets = [7, 0, 0], sizes = [1, 8, 128], strides = [1, 1, 1]} : vector<8x8x128xf32> to vector<1x8x128xf32>
    %518 = vector.shape_cast %517 : vector<1x8x128xf32> to vector<8x128xf32>
    %cst_121 = arith.constant dense<0.000000e+00> : vector<8x128xf32>
    %519 = tpu.matmul %513, %290, %cst_121 {dimension_numbers = #tpu.dot_dimension_numbers<[1], [0], [0], [1], [0, 0, 1, 1], [], []>} : vector<8x32xf32>, vector<32x128xf32>, vector<8x128xf32> -> vector<8x128xf32>
    %520 = arith.addf %518, %519 : vector<8x128xf32>
    %521 = vector.extract_strided_slice %520 {offsets = [0, 0], sizes = [8, 32], strides = [1, 1]} : vector<8x128xf32> to vector<8x32xf32>
    %522 = arith.negf %521 : vector<8x32xf32>
    %523 = math.exp %522 : vector<8x32xf32>
    %cst_122 = arith.constant 1.000000e+00 : f32
    %524 = vector.broadcast %cst_122 : f32 to vector<8x32xf32>
    %525 = arith.addf %524, %523 : vector<8x32xf32>
    %526 = arith.divf %524, %525 : vector<8x32xf32>
    %527 = vector.extract_strided_slice %520 {offsets = [0, 32], sizes = [8, 32], strides = [1, 1]} : vector<8x128xf32> to vector<8x32xf32>
    %528 = arith.negf %527 : vector<8x32xf32>
    %529 = math.exp %528 : vector<8x32xf32>
    %cst_123 = arith.constant 1.000000e+00 : f32
    %530 = vector.broadcast %cst_123 : f32 to vector<8x32xf32>
    %531 = arith.addf %530, %529 : vector<8x32xf32>
    %532 = arith.divf %530, %531 : vector<8x32xf32>
    %533 = vector.extract_strided_slice %520 {offsets = [0, 64], sizes = [8, 32], strides = [1, 1]} : vector<8x128xf32> to vector<8x32xf32>
    %534 = math.tanh %533 : vector<8x32xf32>
    %535 = vector.extract_strided_slice %520 {offsets = [0, 96], sizes = [8, 32], strides = [1, 1]} : vector<8x128xf32> to vector<8x32xf32>
    %536 = arith.negf %535 : vector<8x32xf32>
    %537 = math.exp %536 : vector<8x32xf32>
    %cst_124 = arith.constant 1.000000e+00 : f32
    %538 = vector.broadcast %cst_124 : f32 to vector<8x32xf32>
    %539 = arith.addf %538, %537 : vector<8x32xf32>
    %540 = arith.divf %538, %539 : vector<8x32xf32>
    %541 = arith.mulf %532, %511 : vector<8x32xf32>
    %542 = arith.mulf %526, %534 : vector<8x32xf32>
    %543 = arith.addf %541, %542 : vector<8x32xf32>
    %544 = math.tanh %543 : vector<8x32xf32>
    %545 = arith.mulf %540, %544 : vector<8x32xf32>
    %c7_125 = arith.constant 7 : index
    %c0_126 = arith.constant 0 : index
    %c0_127 = arith.constant 0 : index
    %546 = vector.load %arg4[%c7_125, %c0_126, %c0_127] : memref<12x8x32xf32, #tpu.memory_space<vmem>>, vector<1x8x32xf32>
    %547 = vector.shape_cast %546 : vector<1x8x32xf32> to vector<8x32xf32>
    %548 = vector.shape_cast %545 : vector<8x32xf32> to vector<1x8x32xf32>
    tpu.vector_store %arg4[%c7_125, %c0_126, %c0_127], %548 {strides = array<i32>} : memref<12x8x32xf32, #tpu.memory_space<vmem>>, vector<1x8x32xf32>,
    %c9 = arith.constant 9 : index
    %c0_128 = arith.constant 0 : index
    %c0_129 = arith.constant 0 : index
    %549 = vector.load %arg4[%c9, %c0_128, %c0_129] : memref<12x8x32xf32, #tpu.memory_space<vmem>>, vector<1x8x32xf32>
    %550 = vector.shape_cast %549 : vector<1x8x32xf32> to vector<8x32xf32>
    %551 = vector.shape_cast %545 : vector<8x32xf32> to vector<1x8x32xf32>
    tpu.vector_store %arg4[%c9, %c0_128, %c0_129], %551 {strides = array<i32>} : memref<12x8x32xf32, #tpu.memory_space<vmem>>, vector<1x8x32xf32>,
    %c11 = arith.constant 11 : index
    %c0_130 = arith.constant 0 : index
    %c0_131 = arith.constant 0 : index
    %552 = vector.load %arg4[%c11, %c0_130, %c0_131] : memref<12x8x32xf32, #tpu.memory_space<vmem>>, vector<1x8x32xf32>
    %553 = vector.shape_cast %552 : vector<1x8x32xf32> to vector<8x32xf32>
    %554 = vector.shape_cast %543 : vector<8x32xf32> to vector<1x8x32xf32>
    tpu.vector_store %arg4[%c11, %c0_130, %c0_131], %554 {strides = array<i32>} : memref<12x8x32xf32, #tpu.memory_space<vmem>>, vector<1x8x32xf32>,
    return
  }
}

</mosaic_0001>

<bundles_post_ra>
// kernel: luong_encoder_forward.1
= control target key start
LH: loop header
LB: loop body
LE: loop exit
PB: predicated region body
PF: predicated region fallthrough
CT: control target
= control target key end

     0   :  { %v2499_v2 = vmov 0.0   ;;  %vm2500_vm0 = vmmov 0   ;;  %vm49_vm1 = vcmask 261120   ;;  %s2501_s11 = smov 64   ;;  %s2502_s12 = smov 32   ;;  %s2994_s1 = inlined_call_operand.vmem [shape: f32[2,32,128], index: 1, kind: input, shape index: {}]   ;;  %s2995_s2 = inlined_call_operand.vmem [shape: f32[2,32,128], index: 2, kind: input, shape index: {}]   ;;  %s2996_s0 = inlined_call_operand.vmem [shape: f32[8,8,32], index: 0, kind: input, shape index: {}]   ;;  %s2997_s3 = inlined_call_operand.vmem [shape: f32[2,1,128], index: 3, kind: input, shape index: {}]   ;;  %s2998_s4 = inlined_call_operand.vmem [shape: f32[12,8,32], index: 4, kind: output, shape index: {}]  }
   0x1   :  { %v20_v0 = vld [vmem:[%s2994_s1 + $0x18] sm:$0xff]  ;;  %v19_v1 = vld [vmem:[%s2994_s1 + $0x10] sm:$0xff]  ;;  %2170 = vmatprep.subr.mxu1 %v2499_v2  ;;  %2178 = vmatprep.mubr.msk.f32.mxu1 %vm2500_vm0, %v2499_v2  ;;  %v18_v5 = vld [vmem:[%s2994_s1 + $0x8] sm:$0xff]  ;;  %s2503_s30 = smov 96  }
   0x2   :  { %v2539_v3 = vld [vmem:[%s2995_s2 + $0x18] sm:$0xff]  ;;  %2150 = vmatprep.subr.mxu0 %v20_v0  ;;  %v2547_v4 = vld [vmem:[%s2995_s2 + $0x10] sm:$0xff]  ;;  %v35_v6 = vld [vmem:[%s2996_s0] sm:$0xff] }
   0x3   :  { %2171 = vmatpush3.msra.mxu1 %v2539_v3  ;;  %2151 = vmatpush3.msra.mxu0 %v20_v0  ;;  %v2560_v7 = vld [vmem:[%s2995_s2 + $0x8] sm:$0xff]  ;;  %v17_v8 = vld [vmem:[%s2994_s1] sm:$0xff]  ;;  %v37_v46 = vld [vmem:[%s2996_s0 + $0x10] sm:$0xff] }
   0x4   :  { %2172 = vmatprep.subr.mxu1 %v2499_v2  ;;  %2152 = vmatprep.subr.mxu0 %v19_v1  ;;  %v2570_v9 = vld [vmem:[%s2995_s2] sm:$0xff]  ;;  %v36_v10 = vld [vmem:[%s2996_s0 + $0x8] sm:$0xff]  ;;  %v38_v47 = vld [vmem:[%s2996_s0 + $0x18] sm:$0xff] }
   0x5   :  { %2173 = vmatpush3.msra.mxu1 %v2547_v4  ;;  %2153 = vmatpush3.msra.mxu0 %v19_v1  ;;  %v2603_v13 = vld [vmem:[%s2997_s3] ss:$0 sm:$0xff]  ;;  %v40_v49 = vld [vmem:[%s2996_s0 + $0x28] sm:$0xff]  ;;  %v41_v50 = vld [vmem:[%s2996_s0 + $0x30] sm:$0xff] }
   0x6   :  { %2174 = vmatprep.subr.mxu1 %v2499_v2  ;;  %2154 = vmatprep.subr.mxu0 %v18_v5  ;;  %v39_v48 = vld [vmem:[%s2996_s0 + $0x20] sm:$0xff]  ;;  %v42_v51 = vld [vmem:[%s2996_s0 + $0x38] sm:$0xff] }
   0x7   :  { %2158 = vmatprep.mubr.msk.f32.mxu0 %vm49_vm1, %v35_v6  ;;  %2155 = vmatpush3.msra.mxu0 %v18_v5 }
   0x8   :  { %2175 = vmatpush3.msra.mxu1 %v2560_v7  ;;  %2156 = vmatprep.subr.mxu0 %v17_v8 }
   0x9   :  { %2176 = vmatprep.subr.mxu1 %v2499_v2  ;;  %2157 = vmatpush3.msra.mxu0 %v17_v8 }
   0xa   :  { %2177 = vmatpush3.msra.mxu1 %v2570_v9  ;;  %2159 = vmatmul.mubr.msk.f32.vlgmr.msra.gmra.mxu0 %vm49_vm1, %v36_v10 }
   0xb   :  { %2179 = vmatmul.mubr.f32.vlgmr.msra.gmra.mxu1 %v2499_v2  ;;  %2181 = vmatprep.subr.mxu1 %v2499_v2 }
   0xc   :  { %2189 = vmatprep.mubr.msk.f32.mxu1 %vm2500_vm0, %v2499_v2  ;;  %2182 = vmatpush3.msra.mxu1 %v2539_v3 }
   0xd   :  { %2192 = vmatprep.subr.mxu0 %v2499_v2  ;;  %2183 = vmatprep.subr.mxu1 %v2499_v2 }
   0xe   :  { %2193 = vmatpush3.msra.mxu0 %v2539_v3  ;;  %2184 = vmatpush3.msra.mxu1 %v2547_v4 }
   0xf   :  { %2194 = vmatprep.subr.mxu0 %v2499_v2  ;;  %2185 = vmatprep.subr.mxu1 %v2499_v2 }
  0x10   :  { %2195 = vmatpush3.msra.mxu0 %v2547_v4  ;;  %2186 = vmatpush3.msra.mxu1 %v2560_v7 }
  0x11   :  { %2196 = vmatprep.subr.mxu0 %v2499_v2  ;;  %2187 = vmatprep.subr.mxu1 %v2499_v2 }
  0x12   :  { %2197 = vmatpush3.msra.mxu0 %v2560_v7  ;;  %2188 = vmatpush3.msra.mxu1 %v2570_v9 }
  0x13   :  { %2198 = vmatprep.subr.mxu0 %v2499_v2  ;;  %2203 = vmatprep.subr.mxu1 %v2499_v2 }
  0x14   :  { %2199 = vmatpush3.msra.mxu0 %v2570_v9  ;;  %2161 = vmatprep.mubr.msk.f32.mxu0 %vm49_vm1, %v37_v46 }
  0x15   :  { %2214 = vmatprep.subr.mxu0 %v2499_v2  ;;  %2162 = vmatmul.mubr.msk.f32.gmra.mxu0 %vm49_vm1, %v38_v47 }
  0x16   :  { %2164 = vmatprep.mubr.msk.f32.mxu0 %vm49_vm1, %v39_v48 }
  0x19   :  { %2165 = vmatmul.mubr.msk.f32.gmra.mxu0 %vm49_vm1, %v40_v49 }
  0x1a   :  { %2167 = vmatprep.mubr.msk.f32.mxu0 %vm49_vm1, %v41_v50 }
  0x1d   :  { %2168 = vmatmul.mubr.msk.f32.gmra.mxu0 %vm49_vm1, %v42_v51 }
  0x1e   :  { %2200 = vmatprep.mubr.msk.f32.mxu0 %vm2500_vm0, %v2499_v2 }
  0xca   :  { %v2160_v11 = vpop.f32.mrf.mxu0 }
  0xcb   :  { %v248_v12 = vpop.f32.mrf.mxu1  ;;  %v146_v32 = vadd.f32 %v2160_v11, %v2603_v13 }
  0xcc   :  { %v140_v14 = vpop.f32.mrf.mxu0 }
  0xcd   :  { %v2180_v15 = vpop.f32.mrf.mxu1  ;;  %v141_v16 = vadd.f32 %v2603_v13, %v140_v14 }
  0xcf   :  { %v252_v17 = vadd.f32 %v248_v12, %v141_v16 }
  0xd1   :  { %2371 = vtanh.f32 %v252_v17  ;;  %v1996_v19 = vmul.f32 -1.442695, %v252_v17 }
  0xd3   :  { %2373 = vpow2.f32 %v1996_v19 }
  0xd5   :  { %v2163_v56 = vpop.f32.mrf.mxu0 }
  0xd7   :  { %v150_v57 = vpop.f32.mrf.mxu0 }
  0xd8   :  { %v151_v62 = vadd.f32 %v2603_v13, %v150_v57 }
  0xd9   :  { %v2665_v58 = vpop.f32.mrf.mxu0 }
  0xdb   :  { %v2667_v59 = vpop.f32.mrf.mxu0 }
  0xdd   :  { %v2669_v60 = vpop.f32.mrf.mxu0 }
  0xde   :  { %v2372_v18 = vpop.eup %2371 }
  0xdf   :  { %262 = vrot.lane.b32.xlu0 %v2372_v18, %s2501_s11  ;;  %v2671_v61 = vpop.f32.mrf.mxu0 }
  0xe0   :  { %v2374_v20 = vpop.eup %2373 }
  0xe1   :  { %v256_v21 = vadd.f32 1.0, %v2374_v20 }
  0xe3   :  { %2375 = vrcp.f32 %v256_v21 }
  0xf0   :  { %v2376_v22 = vpop.eup %2375 }
  0xf1   :  { %v260_v25 = vmul.f32 0.0, %v2376_v22 }
 0x151   :  { %v263_v23 = vpop.permute.xlu0 %262 }
 0x152   :  { %v265_v24 = vmul.f32 %v2376_v22, %v263_v23 }
 0x154   :  { %267 = vrot.lane.b32.xlu0 %v265_v24, %s2502_s12 }
 0x1c6   :  { %v268_v26 = vpop.permute.xlu0 %267 }
 0x1c7   :  { %v270_v27 = vadd.f32 %v268_v26, %v260_v25 }
 0x1c9   :  { %2377 = vtanh.f32 %v270_v27 }
 0x1d6   :  { %v2378_v28 = vpop.eup %2377 }
 0x1d7   :  { %273 = vrot.lane.b32.xlu1 %v2378_v28, %s2501_s11 }
 0x249   :  { %v274_v29 = vpop.permute.xlu1 %273 }
 0x24a   :  { %v276_v30 = vmul.f32 %v2376_v22, %v274_v29  ;;  %v156_v22 = vadd.f32 %v2163_v56, %v2603_v13 }
 0x24c   :  { %278 = vrot.lane.b32.xlu1 %v276_v30, %s2502_s12 }
 0x2be   :  { %v279_v31 = vpop.permute.xlu1 %278 }
 0x2bf   :  { %281 = vst.msk [vmem:[#allocation2] sm:$0xff] %vm49_vm1, %v279_v31  ;;  %2190 = vmatmul.mubr.msk.f32.vlgmr.msra.gmra.mxu1 %vm49_vm1, %v279_v31 }
 0x2c0   :  { %2204 = vmatpush3.msra.mxu1 %v2539_v3  ;;  %2211 = vmatprep.mubr.msk.f32.mxu1 %vm2500_vm0, %v2499_v2 }
 0x2c1   :  { %2205 = vmatprep.subr.mxu1 %v2499_v2 }
 0x2c2   :  { %2206 = vmatpush3.msra.mxu1 %v2547_v4 }
 0x2c3   :  { %2207 = vmatprep.subr.mxu1 %v2499_v2 }
 0x2c4   :  { %2208 = vmatpush3.msra.mxu1 %v2560_v7 }
 0x2c5   :  { %2209 = vmatprep.subr.mxu1 %v2499_v2 }
 0x2c6   :  { %2210 = vmatpush3.msra.mxu1 %v2570_v9 }
 0x2c7   :  { %2225 = vmatprep.subr.mxu1 %v2499_v2 }
 0x37f   :  { %v350_v33 = vpop.f32.mrf.mxu1 }
 0x380   :  { %v354_v34 = vadd.f32 %v350_v33, %v146_v32 }
 0x381   :  { %v2191_v35 = vpop.f32.mrf.mxu1 }
 0x382   :  { %2379 = vtanh.f32 %v354_v34  ;;  %v1998_v37 = vmul.f32 -1.442695, %v354_v34 }
 0x384   :  { %2381 = vpow2.f32 %v1998_v37 }
 0x38f   :  { %v2380_v36 = vpop.eup %2379 }
 0x390   :  { %364 = vrot.lane.b32.xlu0 %v2380_v36, %s2501_s11 }
 0x391   :  { %v2382_v38 = vpop.eup %2381 }
 0x392   :  { %v358_v39 = vadd.f32 1.0, %v2382_v38 }
 0x394   :  { %2383 = vrcp.f32 %v358_v39 }
 0x3a1   :  { %v2384_v40 = vpop.eup %2383 }
 0x3a2   :  { %v362_v43 = vmul.f32 %v2384_v40, %v270_v27 }
 0x402   :  { %v365_v41 = vpop.permute.xlu0 %364 }
 0x403   :  { %v367_v42 = vmul.f32 %v2384_v40, %v365_v41 }
 0x405   :  { %369 = vrot.lane.b32.xlu1 %v367_v42, %s2502_s12 }
 0x477   :  { %v370_v44 = vpop.permute.xlu1 %369 }
 0x478   :  { %v372_v45 = vadd.f32 %v370_v44, %v362_v43 }
 0x47a   :  { %2385 = vtanh.f32 %v372_v45 }
 0x487   :  { %v2386_v52 = vpop.eup %2385 }
 0x488   :  { %375 = vrot.lane.b32.xlu0 %v2386_v52, %s2501_s11 }
 0x4fa   :  { %v376_v53 = vpop.permute.xlu0 %375 }
 0x4fb   :  { %v378_v54 = vmul.f32 %v2384_v40, %v376_v53  ;;  %v161_v40 = vadd.f32 %v2603_v13, %v2667_v59 }
 0x4fd   :  { %380 = vrot.lane.b32.xlu1 %v378_v54, %s2502_s12 }
 0x56f   :  { %v381_v55 = vpop.permute.xlu1 %380 }
 0x570   :  { %384 = vst.msk [vmem:[#allocation2 + $0x8] sm:$0xff] %vm49_vm1, %v381_v55  ;;  %2201 = vmatmul.mubr.msk.f32.vlgmr.msra.gmra.mxu0 %vm49_vm1, %v381_v55 }
 0x571   :  { %2215 = vmatpush3.msra.mxu0 %v2539_v3  ;;  %2222 = vmatprep.mubr.msk.f32.mxu0 %vm2500_vm0, %v2499_v2 }
 0x572   :  { %2216 = vmatprep.subr.mxu0 %v2499_v2 }
 0x573   :  { %2217 = vmatpush3.msra.mxu0 %v2547_v4 }
 0x574   :  { %2218 = vmatprep.subr.mxu0 %v2499_v2 }
 0x575   :  { %2219 = vmatpush3.msra.mxu0 %v2560_v7 }
 0x576   :  { %2220 = vmatprep.subr.mxu0 %v2499_v2 }
 0x577   :  { %2221 = vmatpush3.msra.mxu0 %v2570_v9 }
 0x578   :  { %2236 = vmatprep.subr.mxu0 %v2499_v2 }
 0x630   :  { %v453_v63 = vpop.f32.mrf.mxu0 }
 0x631   :  { %v457_v0 = vadd.f32 %v453_v63, %v151_v62 }
 0x632   :  { %v2202_v1 = vpop.f32.mrf.mxu0 }
 0x633   :  { %2387 = vtanh.f32 %v457_v0  ;;  %v2000_v6 = vmul.f32 -1.442695, %v457_v0 }
 0x635   :  { %2389 = vpow2.f32 %v2000_v6 }
 0x640   :  { %v2388_v5 = vpop.eup %2387 }
 0x641   :  { %467 = vrot.lane.b32.xlu0 %v2388_v5, %s2501_s11 }
 0x642   :  { %v2390_v8 = vpop.eup %2389 }
 0x643   :  { %v461_v10 = vadd.f32 1.0, %v2390_v8 }
 0x645   :  { %2391 = vrcp.f32 %v461_v10 }
 0x652   :  { %v2392_v11 = vpop.eup %2391 }
 0x653   :  { %v465_v15 = vmul.f32 %v2392_v11, %v372_v45 }
 0x6b3   :  { %v468_v12 = vpop.permute.xlu0 %467 }
 0x6b4   :  { %v470_v14 = vmul.f32 %v2392_v11, %v468_v12 }
 0x6b6   :  { %472 = vrot.lane.b32.xlu1 %v470_v14, %s2502_s12 }
 0x728   :  { %v473_v16 = vpop.permute.xlu1 %472 }
 0x729   :  { %v475_v17 = vadd.f32 %v473_v16, %v465_v15 }
 0x72b   :  { %2393 = vtanh.f32 %v475_v17 }
 0x738   :  { %v2394_v18 = vpop.eup %2393 }
 0x739   :  { %478 = vrot.lane.b32.xlu0 %v2394_v18, %s2501_s11  ;;  %v1011_v18 = vld [vmem:[#allocation2] sm:$0xff] }
 0x7ab   :  { %v479_v19 = vpop.permute.xlu0 %478 }
 0x7ac   :  { %v481_v20 = vmul.f32 %v2392_v11, %v479_v19  ;;  %v24_v11 = vld [vmem:[%s2994_s1 + $0x38] sm:$0xff]  ;;  %v22_v19 = vld [vmem:[%s2994_s1 + $0x28] sm:$0xff] }
 0x7ae   :  { %483 = vrot.lane.b32.xlu1 %v481_v20, %s2502_s12  ;;  %v21_v20 = vld [vmem:[%s2994_s1 + $0x20] sm:$0xff] }
 0x820   :  { %v484_v21 = vpop.permute.xlu1 %483 }
 0x821   :  { %487 = vst.msk [vmem:[#allocation2 + $0x10] sm:$0xff] %vm49_vm1, %v484_v21  ;;  %2212 = vmatmul.mubr.msk.f32.vlgmr.msra.gmra.mxu1 %vm49_vm1, %v484_v21  ;;  %v1012_v21 = vld [vmem:[#allocation2 + $0x8] sm:$0xff] }
 0x822   :  { %2226 = vmatpush3.msra.mxu1 %v2539_v3  ;;  %2233 = vmatprep.mubr.msk.f32.mxu1 %vm2500_vm0, %v2499_v2 }
 0x823   :  { %2227 = vmatprep.subr.mxu1 %v2499_v2 }
 0x824   :  { %2228 = vmatpush3.msra.mxu1 %v2547_v4 }
 0x825   :  { %2229 = vmatprep.subr.mxu1 %v2499_v2 }
 0x826   :  { %2230 = vmatpush3.msra.mxu1 %v2560_v7 }
 0x827   :  { %2231 = vmatprep.subr.mxu1 %v2499_v2 }
 0x828   :  { %2232 = vmatpush3.msra.mxu1 %v2570_v9 }
 0x829   :  { %2247 = vmatprep.subr.mxu1 %v2499_v2 }
 0x8e1   :  { %v556_v23 = vpop.f32.mrf.mxu1 }
 0x8e2   :  { %v560_v24 = vadd.f32 %v556_v23, %v156_v22  ;;  %v1013_v22 = vld [vmem:[#allocation2 + $0x10] sm:$0xff] }
 0x8e3   :  { %v2213_v25 = vpop.f32.mrf.mxu1 }
 0x8e4   :  { %2395 = vtanh.f32 %v560_v24  ;;  %v2002_v27 = vmul.f32 -1.442695, %v560_v24 }
 0x8e6   :  { %2397 = vpow2.f32 %v2002_v27 }
 0x8f1   :  { %v2396_v26 = vpop.eup %2395 }
 0x8f2   :  { %570 = vrot.lane.b32.xlu0 %v2396_v26, %s2501_s11  ;;  %v171_v26 = vadd.f32 %v2603_v13, %v2671_v61 }
 0x8f3   :  { %v2398_v28 = vpop.eup %2397 }
 0x8f4   :  { %v564_v29 = vadd.f32 1.0, %v2398_v28 }
 0x8f6   :  { %2399 = vrcp.f32 %v564_v29 }
 0x903   :  { %v2400_v30 = vpop.eup %2399 }
 0x904   :  { %v568_v33 = vmul.f32 %v2400_v30, %v475_v17  ;;  %v23_v17 = vld [vmem:[%s2994_s1 + $0x30] sm:$0xff] }
 0x964   :  { %v571_v31 = vpop.permute.xlu0 %570 }
 0x965   :  { %v573_v32 = vmul.f32 %v2400_v30, %v571_v31 }
 0x967   :  { %575 = vrot.lane.b32.xlu1 %v573_v32, %s2502_s12 }
 0x9d9   :  { %v576_v34 = vpop.permute.xlu1 %575 }
 0x9da   :  { %v578_v35 = vadd.f32 %v576_v34, %v568_v33 }
 0x9dc   :  { %2401 = vtanh.f32 %v578_v35 }
 0x9e9   :  { %v2402_v36 = vpop.eup %2401 }
 0x9ea   :  { %581 = vrot.lane.b32.xlu0 %v2402_v36, %s2501_s11 }
 0xa5c   :  { %v582_v37 = vpop.permute.xlu0 %581 }
 0xa5d   :  { %v584_v38 = vmul.f32 %v2400_v30, %v582_v37 }
 0xa5f   :  { %586 = vrot.lane.b32.xlu1 %v584_v38, %s2502_s12 }
 0xad1   :  { %v587_v39 = vpop.permute.xlu1 %586 }
 0xad2   :  { %590 = vst.msk [vmem:[#allocation2 + $0x18] sm:$0xff] %vm49_vm1, %v587_v39  ;;  %2223 = vmatmul.mubr.msk.f32.vlgmr.msra.gmra.mxu0 %vm49_vm1, %v587_v39 }
 0xad3   :  { %2237 = vmatpush3.msra.mxu0 %v2539_v3  ;;  %2244 = vmatprep.mubr.msk.f32.mxu0 %vm2500_vm0, %v2499_v2 }
 0xad4   :  { %2238 = vmatprep.subr.mxu0 %v2499_v2 }
 0xad5   :  { %2239 = vmatpush3.msra.mxu0 %v2547_v4 }
 0xad6   :  { %2240 = vmatprep.subr.mxu0 %v2499_v2 }
 0xad7   :  { %2241 = vmatpush3.msra.mxu0 %v2560_v7 }
 0xad8   :  { %2242 = vmatprep.subr.mxu0 %v2499_v2 }
 0xad9   :  { %2243 = vmatpush3.msra.mxu0 %v2570_v9  ;;  %v1014_v23 = vld [vmem:[#allocation2 + $0x18] sm:$0xff] }
 0xada   :  { %2258 = vmatprep.subr.mxu0 %v24_v11 }
 0xb92   :  { %v659_v41 = vpop.f32.mrf.mxu0 }
 0xb93   :  { %v663_v42 = vadd.f32 %v659_v41, %v161_v40  ;;  %v2762_v40 = vld [vmem:[%s2995_s2 + $0x38] sm:$0xff]  ;;  %v2768_v41 = vld [vmem:[%s2995_s2 + $0x30] sm:$0xff] }
 0xb94   :  { %v2224_v43 = vpop.f32.mrf.mxu0 }
 0xb95   :  { %2403 = vtanh.f32 %v663_v42  ;;  %v2004_v45 = vmul.f32 -1.442695, %v663_v42  ;;  %v2775_v42 = vld [vmem:[%s2995_s2 + $0x28] sm:$0xff]  ;;  %v2782_v43 = vld [vmem:[%s2995_s2 + $0x20] sm:$0xff] }
 0xb97   :  { %2405 = vpow2.f32 %v2004_v45 }
 0xba2   :  { %v2404_v44 = vpop.eup %2403 }
 0xba3   :  { %673 = vrot.lane.b32.xlu0 %v2404_v44, %s2501_s11 }
 0xba4   :  { %v2406_v46 = vpop.eup %2405 }
 0xba5   :  { %v667_v47 = vadd.f32 1.0, %v2406_v46 }
 0xba7   :  { %2407 = vrcp.f32 %v667_v47 }
 0xbb4   :  { %v2408_v48 = vpop.eup %2407 }
 0xbb5   :  { %v671_v51 = vmul.f32 %v2408_v48, %v578_v35 }
 0xc15   :  { %v674_v49 = vpop.permute.xlu0 %673 }
 0xc16   :  { %v676_v50 = vmul.f32 %v2408_v48, %v674_v49 }
 0xc18   :  { %678 = vrot.lane.b32.xlu1 %v676_v50, %s2502_s12 }
 0xc8a   :  { %v679_v52 = vpop.permute.xlu1 %678 }
 0xc8b   :  { %v681_v53 = vadd.f32 %v679_v52, %v671_v51 }
 0xc8d   :  { %2409 = vtanh.f32 %v681_v53 }
 0xc9a   :  { %v2410_v54 = vpop.eup %2409 }
 0xc9b   :  { %684 = vrot.lane.b32.xlu0 %v2410_v54, %s2501_s11  ;;  %v2819_v54 = vld [vmem:[%s2997_s3 + $0x1] ss:$0 sm:$0xff] }
 0xd0d   :  { %v685_v55 = vpop.permute.xlu0 %684 }
 0xd0e   :  { %v687_v56 = vmul.f32 %v2408_v48, %v685_v55  ;;  %v176_v48 = vadd.f32 %v2669_v60, %v2603_v13 }
 0xd10   :  { %689 = vrot.lane.b32.xlu1 %v687_v56, %s2502_s12 }
 0xd82   :  { %v690_v57 = vpop.permute.xlu1 %689 }
 0xd83   :  { %693 = vst.msk [vmem:[#allocation2 + $0x20] sm:$0xff] %vm49_vm1, %v690_v57  ;;  %2234 = vmatmul.mubr.msk.f32.vlgmr.msra.gmra.mxu1 %vm49_vm1, %v690_v57 }
 0xd84   :  { %2248 = vmatpush3.msra.mxu1 %v2539_v3  ;;  %2255 = vmatprep.mubr.msk.f32.mxu1 %vm2500_vm0, %v2499_v2  ;;  %v166_v3 = vadd.f32 %v2665_v58, %v2603_v13 }
 0xd85   :  { %2249 = vmatprep.subr.mxu1 %v2499_v2 }
 0xd86   :  { %2250 = vmatpush3.msra.mxu1 %v2547_v4 }
 0xd87   :  { %2251 = vmatprep.subr.mxu1 %v2499_v2 }
 0xd88   :  { %2252 = vmatpush3.msra.mxu1 %v2560_v7 }
 0xd89   :  { %2253 = vmatprep.subr.mxu1 %v2499_v2 }
 0xd8a   :  { %2254 = vmatpush3.msra.mxu1 %v2570_v9  ;;  %v1015_v24 = vld [vmem:[#allocation2 + $0x20] sm:$0xff] }
 0xd8b   :  { %2278 = vmatprep.subr.mxu1 %v2499_v2 }
 0xe43   :  { %v762_v59 = vpop.f32.mrf.mxu1 }
 0xe44   :  { %v766_v62 = vadd.f32 %v762_v59, %v166_v3 }
 0xe45   :  { %v2235_v63 = vpop.f32.mrf.mxu1 }
 0xe46   :  { %2411 = vtanh.f32 %v766_v62  ;;  %v2006_v4 = vmul.f32 -1.442695, %v766_v62 }
 0xe48   :  { %2413 = vpow2.f32 %v2006_v4 }
 0xe53   :  { %v2412_v0 = vpop.eup %2411 }
 0xe54   :  { %776 = vrot.lane.b32.xlu0 %v2412_v0, %s2501_s11 }
 0xe55   :  { %v2414_v1 = vpop.eup %2413 }
 0xe56   :  { %v770_v7 = vadd.f32 1.0, %v2414_v1 }
 0xe58   :  { %2415 = vrcp.f32 %v770_v7 }
 0xe65   :  { %v2416_v5 = vpop.eup %2415 }
 0xe66   :  { %v774_v8 = vmul.f32 %v2416_v5, %v681_v53 }
 0xec6   :  { %v777_v6 = vpop.permute.xlu0 %776 }
 0xec7   :  { %v779_v9 = vmul.f32 %v2416_v5, %v777_v6 }
 0xec9   :  { %781 = vrot.lane.b32.xlu1 %v779_v9, %s2502_s12 }
 0xf3b   :  { %v782_v10 = vpop.permute.xlu1 %781 }
 0xf3c   :  { %v784_v58 = vadd.f32 %v782_v10, %v774_v8 }
 0xf3e   :  { %2417 = vtanh.f32 %v784_v58 }
 0xf4b   :  { %v2418_v12 = vpop.eup %2417 }
 0xf4c   :  { %787 = vrot.lane.b32.xlu0 %v2418_v12, %s2501_s11 }
 0xfbe   :  { %v788_v14 = vpop.permute.xlu0 %787 }
 0xfbf   :  { %v790_v15 = vmul.f32 %v2416_v5, %v788_v14 }
 0xfc1   :  { %792 = vrot.lane.b32.xlu1 %v790_v15, %s2502_s12 }
0x1033   :  { %v793_v16 = vpop.permute.xlu1 %792 }
0x1034   :  { %796 = vst.msk [vmem:[#allocation2 + $0x28] sm:$0xff] %vm49_vm1, %v793_v16  ;;  %2245 = vmatmul.mubr.msk.f32.vlgmr.msra.gmra.mxu0 %vm49_vm1, %v793_v16 }
0x1035   :  { %2259 = vmatpush3.msra.mxu0 %v24_v11  ;;  %2266 = vmatprep.mubr.msk.f32.mxu0 %vm49_vm1, %v1011_v18 }
0x1036   :  { %2260 = vmatprep.subr.mxu0 %v23_v17 }
0x1037   :  { %2261 = vmatpush3.msra.mxu0 %v23_v17 }
0x1038   :  { %2262 = vmatprep.subr.mxu0 %v22_v19 }
0x1039   :  { %2263 = vmatpush3.msra.mxu0 %v22_v19 }
0x103a   :  { %2264 = vmatprep.subr.mxu0 %v21_v20 }
0x103b   :  { %2265 = vmatpush3.msra.mxu0 %v21_v20  ;;  %v1016_v25 = vld [vmem:[#allocation2 + $0x28] sm:$0xff] }
0x103c   :  { %2267 = vmatmul.mubr.msk.f32.vlgmr.msra.gmra.mxu0 %vm49_vm1, %v1012_v21  ;;  %2300 = vmatprep.subr.mxu0 %v2499_v2 }
0x103d   :  { %2269 = vmatprep.mubr.msk.f32.mxu0 %vm49_vm1, %v1013_v22  ;;  %2301 = vmatpush3.msra.mxu0 %v2762_v40 }
0x103e   :  { %2302 = vmatprep.subr.mxu0 %v2499_v2 }
0x103f   :  { %2303 = vmatpush3.msra.mxu0 %v2768_v41 }
0x1040   :  { %2270 = vmatmul.mubr.msk.f32.gmra.mxu0 %vm49_vm1, %v1014_v23  ;;  %2304 = vmatprep.subr.mxu0 %v2499_v2 }
0x1041   :  { %2272 = vmatprep.mubr.msk.f32.mxu0 %vm49_vm1, %v1015_v24  ;;  %2305 = vmatpush3.msra.mxu0 %v2775_v42 }
0x1042   :  { %2306 = vmatprep.subr.mxu0 %v2499_v2 }
0x1043   :  { %2307 = vmatpush3.msra.mxu0 %v2782_v43 }
0x1044   :  { %2273 = vmatmul.mubr.msk.f32.gmra.mxu0 %vm49_vm1, %v1016_v25  ;;  %2322 = vmatprep.subr.mxu0 %v2499_v2 }
0x10f4   :  { %v865_v27 = vpop.f32.mrf.mxu0 }
0x10f5   :  { %v869_v28 = vadd.f32 %v865_v27, %v171_v26 }
0x10f6   :  { %v2246_v29 = vpop.f32.mrf.mxu0 }
0x10f7   :  { %2419 = vtanh.f32 %v869_v28  ;;  %v2008_v31 = vmul.f32 -1.442695, %v869_v28 }
0x10f9   :  { %2421 = vpow2.f32 %v2008_v31 }
0x10fc   :  { %v2814_v49 = vpop.f32.mrf.mxu0 }
0x10fd   :  { %v1121_v24 = vadd.f32 %v2814_v49, %v2819_v54 }
0x10fe   :  { %v1115_v53 = vpop.f32.mrf.mxu0 }
0x10ff   :  { %v1116_v55 = vadd.f32 %v2819_v54, %v1115_v53 }
0x1104   :  { %v2420_v30 = vpop.eup %2419 }
0x1105   :  { %879 = vrot.lane.b32.xlu0 %v2420_v30, %s2501_s11 }
0x1106   :  { %v2422_v32 = vpop.eup %2421 }
0x1107   :  { %v873_v33 = vadd.f32 1.0, %v2422_v32 }
0x1109   :  { %2423 = vrcp.f32 %v873_v33 }
0x1116   :  { %v2424_v34 = vpop.eup %2423 }
0x1117   :  { %v877_v37 = vmul.f32 %v2424_v34, %v784_v58 }
0x1177   :  { %v880_v35 = vpop.permute.xlu0 %879 }
0x1178   :  { %v882_v36 = vmul.f32 %v2424_v34, %v880_v35 }
0x117a   :  { %884 = vrot.lane.b32.xlu1 %v882_v36, %s2502_s12 }
0x11ec   :  { %v885_v38 = vpop.permute.xlu1 %884 }
0x11ed   :  { %v2755_v61 = vadd.f32 %v885_v38, %v877_v37 }
0x11ef   :  { %2425 = vtanh.f32 %v2755_v61 }
0x11fc   :  { %v2426_v39 = vpop.eup %2425 }
0x11fd   :  { %890 = vrot.lane.b32.xlu0 %v2426_v39, %s2501_s11 }
0x126f   :  { %v891_v44 = vpop.permute.xlu0 %890 }
0x1270   :  { %v893_v45 = vmul.f32 %v2424_v34, %v891_v44 }
0x1272   :  { %895 = vrot.lane.b32.xlu1 %v893_v45, %s2502_s12 }
0x12e4   :  { %v896_v46 = vpop.permute.xlu1 %895 }
0x12e5   :  { %899 = vst.msk [vmem:[#allocation2 + $0x30] sm:$0xff] %vm49_vm1, %v896_v46  ;;  %2256 = vmatmul.mubr.msk.f32.vlgmr.msra.gmra.mxu1 %vm49_vm1, %v896_v46 }
0x12e6   :  { %2279 = vmatpush3.msra.mxu1 %v2762_v40  ;;  %2286 = vmatprep.mubr.msk.f32.mxu1 %vm2500_vm0, %v2499_v2 }
0x12e7   :  { %2280 = vmatprep.subr.mxu1 %v2499_v2 }
0x12e8   :  { %2281 = vmatpush3.msra.mxu1 %v2768_v41 }
0x12e9   :  { %2282 = vmatprep.subr.mxu1 %v2499_v2 }
0x12ea   :  { %2283 = vmatpush3.msra.mxu1 %v2775_v42 }
0x12eb   :  { %2284 = vmatprep.subr.mxu1 %v2499_v2 }
0x12ec   :  { %2285 = vmatpush3.msra.mxu1 %v2782_v43  ;;  %v1017_v47 = vld [vmem:[#allocation2 + $0x30] sm:$0xff] }
0x12ed   :  { %2287 = vmatmul.mubr.f32.vlgmr.msra.gmra.mxu1 %v2499_v2  ;;  %2275 = vmatprep.mubr.msk.f32.mxu0 %vm49_vm1, %v1017_v47  ;;  %v2271_v47 = vpop.f32.mrf.mxu0 }
0x12ee   :  { %2289 = vmatprep.subr.mxu1 %v2499_v2  ;;  %2297 = vmatprep.mubr.msk.f32.mxu1 %vm2500_vm0, %v2499_v2 }
0x12ef   :  { %2290 = vmatpush3.msra.mxu1 %v2762_v40 }
0x12f0   :  { %2291 = vmatprep.subr.mxu1 %v2499_v2 }
0x12f1   :  { %2292 = vmatpush3.msra.mxu1 %v2768_v41 }
0x12f2   :  { %2293 = vmatprep.subr.mxu1 %v2499_v2 }
0x12f3   :  { %2294 = vmatpush3.msra.mxu1 %v2775_v42 }
0x12f4   :  { %2295 = vmatprep.subr.mxu1 %v2499_v2 }
0x12f5   :  { %2296 = vmatpush3.msra.mxu1 %v2782_v43 }
0x12f6   :  { %2311 = vmatprep.subr.mxu1 %v2499_v2 }
0x13a5   :  { %v968_v50 = vpop.f32.mrf.mxu1 }
0x13a6   :  { %v972_v51 = vadd.f32 %v968_v50, %v176_v48  ;;  %v1125_v48 = vpop.f32.mrf.mxu0 }
0x13a7   :  { %v2257_v52 = vpop.f32.mrf.mxu1  ;;  %v1126_v53 = vadd.f32 %v2819_v54, %v1125_v48 }
0x13a8   :  { %v2010_v8 = vmul.f32 -1.442695, %v972_v51  ;;  %v2882_v49 = vpop.f32.mrf.mxu0 }
0x13aa   :  { %v2884_v50 = vpop.f32.mrf.mxu0 }
0x13ad   :  { %v1220_v56 = vpop.f32.mrf.mxu1 }
0x13ae   :  { %v1224_v57 = vadd.f32 %v1220_v56, %v1116_v55 }
0x13af   :  { %v2288_v3 = vpop.f32.mrf.mxu1 }
0x13b0   :  { %2427 = vtanh.f32 %v1224_v57  ;;  %v2022_v13 = vmul.f32 -1.442695, %v1224_v57 }
0x13b2   :  { %2429 = vpow2.f32 %v2022_v13 }
0x13bd   :  { %v2428_v59 = vpop.eup %2427 }
0x13be   :  { %1234 = vrot.lane.b32.xlu0 %v2428_v59, %s2501_s11 }
0x13bf   :  { %v2430_v60 = vpop.eup %2429 }
0x13c0   :  { %v1228_v62 = vadd.f32 1.0, %v2430_v60 }
0x13c2   :  { %2431 = vrcp.f32 %v1228_v62 }
0x13cf   :  { %v2432_v63 = vpop.eup %2431 }
0x13d0   :  { %v1232_v1 = vmul.f32 0.0, %v2432_v63 }
0x1430   :  { %v1235_v0 = vpop.permute.xlu0 %1234 }
0x1431   :  { %v1237_v4 = vmul.f32 %v2432_v63, %v1235_v0 }
0x1433   :  { %1239 = vrot.lane.b32.xlu1 %v1237_v4, %s2502_s12 }
0x14a5   :  { %v1240_v7 = vpop.permute.xlu1 %1239 }
0x14a6   :  { %v2824_v5 = vadd.f32 %v1240_v7, %v1232_v1 }
0x14a8   :  { %2433 = vtanh.f32 %v2824_v5 }
0x14a9   :  { %2435 = vtanh.f32 %v972_v51 }
0x14aa   :  { %2437 = vpow2.f32 %v2010_v8 }
0x14b5   :  { %v2434_v6 = vpop.eup %2433 }
0x14b6   :  { %1245 = vrot.lane.b32.xlu0 %v2434_v6, %s2501_s11  ;;  %v2436_v9 = vpop.eup %2435 }
0x14b7   :  { %v2438_v10 = vpop.eup %2437 }
0x14b8   :  { %v976_v58 = vadd.f32 1.0, %v2438_v10  ;;  %v1131_v10 = vadd.f32 %v2271_v47, %v2819_v54 }
0x14ba   :  { %982 = vrot.lane.b32.xlu0 %v2436_v9, %s2501_s11  ;;  %2439 = vrcp.f32 %v976_v58 }
0x14c7   :  { %v2440_v14 = vpop.eup %2439 }
0x14c8   :  { %v980_v18 = vmul.f32 %v2440_v14, %v2755_v61 }
0x1528   :  { %v1246_v11 = vpop.permute.xlu0 %1245 }
0x1529   :  { %v1248_v12 = vmul.f32 %v2432_v63, %v1246_v11 }
0x152b   :  { %1250 = vrot.lane.b32.xlu1 %v1248_v12, %s2502_s12 }
0x152c   :  { %v983_v15 = vpop.permute.xlu0 %982 }
0x152d   :  { %v985_v16 = vmul.f32 %v2440_v14, %v983_v15 }
0x152f   :  { %987 = vrot.lane.b32.xlu0 %v985_v16, %s2502_s12 }
0x159d   :  { %v1251_v17 = vpop.permute.xlu1 %1250 }
0x159e   :  { %1253 = vst.msk [vmem:[%s2998_s4] sm:$0xff] %vm49_vm1, %v1251_v17  ;;  %2298 = vmatmul.mubr.msk.f32.vlgmr.msra.gmra.mxu1 %vm49_vm1, %v1251_v17 }
0x159f   :  { %2312 = vmatpush3.msra.mxu1 %v2762_v40  ;;  %2319 = vmatprep.mubr.msk.f32.mxu1 %vm2500_vm0, %v2499_v2 }
0x15a0   :  { %2313 = vmatprep.subr.mxu1 %v2499_v2 }
0x15a1   :  { %v988_v19 = vpop.permute.xlu0 %987  ;;  %2314 = vmatpush3.msra.mxu1 %v2768_v41 }
0x15a2   :  { %v2842_v20 = vadd.f32 %v988_v19, %v980_v18  ;;  %2315 = vmatprep.subr.mxu1 %v2499_v2 }
0x15a3   :  { %2316 = vmatpush3.msra.mxu1 %v2775_v42 }
0x15a4   :  { %2441 = vtanh.f32 %v2842_v20  ;;  %2317 = vmatprep.subr.mxu1 %v2499_v2 }
0x15a5   :  { %2318 = vmatpush3.msra.mxu1 %v2782_v43 }
0x15a6   :  { %2333 = vmatprep.subr.mxu1 %v2499_v2 }
0x15b1   :  { %v2442_v21 = vpop.eup %2441 }
0x15b2   :  { %993 = vrot.lane.b32.xlu0 %v2442_v21, %s2501_s11 }
0x1624   :  { %v994_v22 = vpop.permute.xlu0 %993 }
0x1625   :  { %v996_v23 = vmul.f32 %v2440_v14, %v994_v22 }
0x1627   :  { %998 = vrot.lane.b32.xlu0 %v996_v23, %s2502_s12 }
0x165e   :  { %v1322_v25 = vpop.f32.mrf.mxu1 }
0x165f   :  { %v1326_v26 = vadd.f32 %v1322_v25, %v1121_v24 }
0x1660   :  { %v2299_v27 = vpop.f32.mrf.mxu1 }
0x1661   :  { %2443 = vtanh.f32 %v1326_v26  ;;  %v2024_v31 = vmul.f32 -1.442695, %v1326_v26 }
0x1663   :  { %2445 = vpow2.f32 %v2024_v31 }
0x166e   :  { %v2444_v28 = vpop.eup %2443 }
0x166f   :  { %1336 = vrot.lane.b32.xlu1 %v2444_v28, %s2501_s11 }
0x1670   :  { %v2446_v32 = vpop.eup %2445 }
0x1671   :  { %v1330_v33 = vadd.f32 1.0, %v2446_v32 }
0x1673   :  { %2447 = vrcp.f32 %v1330_v33 }
0x1680   :  { %v2448_v34 = vpop.eup %2447 }
0x1681   :  { %v1334_v37 = vmul.f32 %v2448_v34, %v2824_v5 }
0x1699   :  { %v999_v29 = vpop.permute.xlu0 %998 }
0x169a   :  { %1002 = vst.msk [vmem:[#allocation2 + $0x38] sm:$0xff] %vm49_vm1, %v999_v29  ;;  %2011 = vst.msk [vmem:[%s2998_s4 + $0x40] sm:$0xff] %vm49_vm1, %v999_v29  ;;  %v1136_v29 = vadd.f32 %v2819_v54, %v2884_v50 }
0x16a1   :  { %v1018_v30 = vld [vmem:[#allocation2 + $0x38] sm:$0xff] }
0x16a2   :  { %2276 = vmatmul.mubr.msk.f32.gmra.mxu0 %vm49_vm1, %v1018_v30 }
0x16a3   :  { %2308 = vmatprep.mubr.msk.f32.mxu0 %vm2500_vm0, %v2499_v2 }
0x16e1   :  { %v1337_v35 = vpop.permute.xlu1 %1336 }
0x16e2   :  { %v1339_v36 = vmul.f32 %v2448_v34, %v1337_v35 }
0x16e4   :  { %1341 = vrot.lane.b32.xlu1 %v1339_v36, %s2502_s12 }
0x1756   :  { %v1342_v38 = vpop.permute.xlu1 %1341 }
0x1757   :  { %v1344_v61 = vadd.f32 %v1342_v38, %v1334_v37 }
0x1759   :  { %2449 = vtanh.f32 %v1344_v61 }
0x1762   :  { %v2886_v51 = vpop.f32.mrf.mxu0 }
0x1764   :  { %v2888_v52 = vpop.f32.mrf.mxu0 }
0x1766   :  { %v2450_v39 = vpop.eup %2449 }
0x1767   :  { %1347 = vrot.lane.b32.xlu1 %v2450_v39, %s2501_s11 }
0x17d9   :  { %v1348_v44 = vpop.permute.xlu1 %1347 }
0x17da   :  { %v1350_v45 = vmul.f32 %v2448_v34, %v1348_v44 }
0x17dc   :  { %1352 = vrot.lane.b32.xlu1 %v1350_v45, %s2502_s12 }
0x184e   :  { %v1353_v46 = vpop.permute.xlu1 %1352 }
0x184f   :  { %2025 = vst.msk [vmem:[%s2998_s4 + $0x8] sm:$0xff] %vm49_vm1, %v1353_v46  ;;  %2309 = vmatmul.mubr.msk.f32.vlgmr.msra.gmra.mxu0 %vm49_vm1, %v1353_v46 }
0x1850   :  { %2323 = vmatpush3.msra.mxu0 %v2762_v40  ;;  %2330 = vmatprep.mubr.msk.f32.mxu0 %vm2500_vm0, %v2499_v2 }
0x1851   :  { %2324 = vmatprep.subr.mxu0 %v2499_v2 }
0x1852   :  { %2325 = vmatpush3.msra.mxu0 %v2768_v41 }
0x1853   :  { %2326 = vmatprep.subr.mxu0 %v2499_v2 }
0x1854   :  { %2327 = vmatpush3.msra.mxu0 %v2775_v42 }
0x1855   :  { %2328 = vmatprep.subr.mxu0 %v2499_v2 }
0x1856   :  { %2329 = vmatpush3.msra.mxu0 %v2782_v43 }
0x1857   :  { %2344 = vmatprep.subr.mxu0 %v2499_v2 }
0x190f   :  { %v1425_v55 = vpop.f32.mrf.mxu0 }
0x1910   :  { %v1429_v56 = vadd.f32 %v1425_v55, %v1126_v53  ;;  %v1141_v53 = vadd.f32 %v2882_v49, %v2819_v54 }
0x1911   :  { %v2310_v57 = vpop.f32.mrf.mxu0 }
0x1912   :  { %2451 = vtanh.f32 %v1429_v56  ;;  %v2027_v59 = vmul.f32 -1.442695, %v1429_v56 }
0x1914   :  { %2453 = vpow2.f32 %v2027_v59 }
0x191f   :  { %v2452_v3 = vpop.eup %2451 }
0x1920   :  { %1439 = vrot.lane.b32.xlu0 %v2452_v3, %s2501_s11 }
0x1921   :  { %v2454_v13 = vpop.eup %2453 }
0x1922   :  { %v1433_v60 = vadd.f32 1.0, %v2454_v13 }
0x1924   :  { %2455 = vrcp.f32 %v1433_v60 }
0x1931   :  { %v2456_v62 = vpop.eup %2455 }
0x1932   :  { %v1437_v4 = vmul.f32 %v2456_v62, %v1344_v61 }
0x1992   :  { %v1440_v63 = vpop.permute.xlu0 %1439 }
0x1993   :  { %v1442_v0 = vmul.f32 %v2456_v62, %v1440_v63 }
0x1995   :  { %1444 = vrot.lane.b32.xlu1 %v1442_v0, %s2502_s12 }
0x1a07   :  { %v1445_v1 = vpop.permute.xlu1 %1444 }
0x1a08   :  { %v1447_v7 = vadd.f32 %v1445_v1, %v1437_v4  ;;  %v1146_v1 = vadd.f32 %v2819_v54, %v2888_v52 }
0x1a0a   :  { %2457 = vtanh.f32 %v1447_v7 }
0x1a17   :  { %v2458_v5 = vpop.eup %2457 }
0x1a18   :  { %1450 = vrot.lane.b32.xlu0 %v2458_v5, %s2501_s11 }
0x1a8a   :  { %v1451_v6 = vpop.permute.xlu0 %1450 }
0x1a8b   :  { %v1453_v9 = vmul.f32 %v2456_v62, %v1451_v6 }
0x1a8d   :  { %1455 = vrot.lane.b32.xlu1 %v1453_v9, %s2502_s12 }
0x1aff   :  { %v1456_v8 = vpop.permute.xlu1 %1455 }
0x1b00   :  { %2028 = vst.msk [vmem:[%s2998_s4 + $0x10] sm:$0xff] %vm49_vm1, %v1456_v8  ;;  %2320 = vmatmul.mubr.msk.f32.vlgmr.msra.gmra.mxu1 %vm49_vm1, %v1456_v8 }
0x1b01   :  { %2334 = vmatpush3.msra.mxu1 %v2762_v40  ;;  %2341 = vmatprep.mubr.msk.f32.mxu1 %vm2500_vm0, %v2499_v2 }
0x1b02   :  { %2335 = vmatprep.subr.mxu1 %v2499_v2 }
0x1b03   :  { %2336 = vmatpush3.msra.mxu1 %v2768_v41 }
0x1b04   :  { %2337 = vmatprep.subr.mxu1 %v2499_v2 }
0x1b05   :  { %2338 = vmatpush3.msra.mxu1 %v2775_v42 }
0x1b06   :  { %2339 = vmatprep.subr.mxu1 %v2499_v2 }
0x1b07   :  { %2340 = vmatpush3.msra.mxu1 %v2782_v43 }
0x1b08   :  { %2355 = vmatprep.subr.mxu1 %v2499_v2 }
0x1bc0   :  { %v1528_v58 = vpop.f32.mrf.mxu1 }
0x1bc1   :  { %v1532_v11 = vadd.f32 %v1528_v58, %v1131_v10 }
0x1bc2   :  { %v2321_v12 = vpop.f32.mrf.mxu1 }
0x1bc3   :  { %2459 = vtanh.f32 %v1532_v11  ;;  %v2030_v15 = vmul.f32 -1.442695, %v1532_v11 }
0x1bc5   :  { %2461 = vpow2.f32 %v2030_v15 }
0x1bd0   :  { %v2460_v14 = vpop.eup %2459 }
0x1bd1   :  { %1542 = vrot.lane.b32.xlu0 %v2460_v14, %s2501_s11 }
0x1bd2   :  { %v2462_v16 = vpop.eup %2461 }
0x1bd3   :  { %v1536_v17 = vadd.f32 1.0, %v2462_v16 }
0x1bd5   :  { %2463 = vrcp.f32 %v1536_v17 }
0x1be2   :  { %v2464_v18 = vpop.eup %2463 }
0x1be3   :  { %v1540_v22 = vmul.f32 %v2464_v18, %v1447_v7 }
0x1c43   :  { %v1543_v19 = vpop.permute.xlu0 %1542 }
0x1c44   :  { %v1545_v21 = vmul.f32 %v2464_v18, %v1543_v19 }
0x1c46   :  { %1547 = vrot.lane.b32.xlu1 %v1545_v21, %s2502_s12 }
0x1cb8   :  { %v1548_v23 = vpop.permute.xlu1 %1547 }
0x1cb9   :  { %v1550_v24 = vadd.f32 %v1548_v23, %v1540_v22  ;;  %v1151_v22 = vadd.f32 %v2886_v51, %v2819_v54 }
0x1cbb   :  { %2465 = vtanh.f32 %v1550_v24 }
0x1cc8   :  { %v2466_v25 = vpop.eup %2465 }
0x1cc9   :  { %1553 = vrot.lane.b32.xlu0 %v2466_v25, %s2501_s11 }
0x1d3b   :  { %v1554_v26 = vpop.permute.xlu0 %1553 }
0x1d3c   :  { %v1556_v27 = vmul.f32 %v2464_v18, %v1554_v26 }
0x1d3e   :  { %1558 = vrot.lane.b32.xlu1 %v1556_v27, %s2502_s12 }
0x1db0   :  { %v1559_v28 = vpop.permute.xlu1 %1558 }
0x1db1   :  { %2031 = vst.msk [vmem:[%s2998_s4 + $0x18] sm:$0xff] %vm49_vm1, %v1559_v28  ;;  %2331 = vmatmul.mubr.msk.f32.vlgmr.msra.gmra.mxu0 %vm49_vm1, %v1559_v28 }
0x1db2   :  { %2345 = vmatpush3.msra.mxu0 %v2762_v40  ;;  %2352 = vmatprep.mubr.msk.f32.mxu0 %vm2500_vm0, %v2499_v2 }
0x1db3   :  { %2346 = vmatprep.subr.mxu0 %v2499_v2 }
0x1db4   :  { %2347 = vmatpush3.msra.mxu0 %v2768_v41 }
0x1db5   :  { %2348 = vmatprep.subr.mxu0 %v2499_v2 }
0x1db6   :  { %2349 = vmatpush3.msra.mxu0 %v2775_v42 }
0x1db7   :  { %2350 = vmatprep.subr.mxu0 %v2499_v2 }
0x1db8   :  { %2351 = vmatpush3.msra.mxu0 %v2782_v43 }
0x1e71   :  { %v1631_v30 = vpop.f32.mrf.mxu0 }
0x1e72   :  { %v1635_v31 = vadd.f32 %v1631_v30, %v1136_v29 }
0x1e73   :  { %v2332_v32 = vpop.f32.mrf.mxu0 }
0x1e74   :  { %2467 = vtanh.f32 %v1635_v31  ;;  %v2033_v34 = vmul.f32 -1.442695, %v1635_v31 }
0x1e76   :  { %2469 = vpow2.f32 %v2033_v34 }
0x1e81   :  { %v2468_v33 = vpop.eup %2467 }
0x1e82   :  { %1645 = vrot.lane.b32.xlu0 %v2468_v33, %s2501_s11 }
0x1e83   :  { %v2470_v35 = vpop.eup %2469 }
0x1e84   :  { %v1639_v36 = vadd.f32 1.0, %v2470_v35 }
0x1e86   :  { %2471 = vrcp.f32 %v1639_v36 }
0x1e93   :  { %v2472_v37 = vpop.eup %2471 }
0x1e94   :  { %v1643_v39 = vmul.f32 %v2472_v37, %v1550_v24 }
0x1ef4   :  { %v1646_v38 = vpop.permute.xlu0 %1645 }
0x1ef5   :  { %v1648_v61 = vmul.f32 %v2472_v37, %v1646_v38 }
0x1ef7   :  { %1650 = vrot.lane.b32.xlu1 %v1648_v61, %s2502_s12 }
0x1f69   :  { %v1651_v44 = vpop.permute.xlu1 %1650 }
0x1f6a   :  { %v1653_v45 = vadd.f32 %v1651_v44, %v1643_v39 }
0x1f6c   :  { %2473 = vtanh.f32 %v1653_v45 }
0x1f79   :  { %v2474_v46 = vpop.eup %2473 }
0x1f7a   :  { %1656 = vrot.lane.b32.xlu0 %v2474_v46, %s2501_s11 }
0x1fec   :  { %v1657_v47 = vpop.permute.xlu0 %1656 }
0x1fed   :  { %v1659_v48 = vmul.f32 %v2472_v37, %v1657_v47 }
0x1fef   :  { %1661 = vrot.lane.b32.xlu1 %v1659_v48, %s2502_s12 }
0x2061   :  { %v1662_v50 = vpop.permute.xlu1 %1661 }
0x2062   :  { %2034 = vst.msk [vmem:[%s2998_s4 + $0x20] sm:$0xff] %vm49_vm1, %v1662_v50  ;;  %2342 = vmatmul.mubr.msk.f32.vlgmr.msra.gmra.mxu1 %vm49_vm1, %v1662_v50 }
0x2063   :  { %2356 = vmatpush3.msra.mxu1 %v2762_v40  ;;  %2363 = vmatprep.mubr.msk.f32.mxu1 %vm2500_vm0, %v2499_v2 }
0x2064   :  { %2357 = vmatprep.subr.mxu1 %v2499_v2 }
0x2065   :  { %2358 = vmatpush3.msra.mxu1 %v2768_v41 }
0x2066   :  { %2359 = vmatprep.subr.mxu1 %v2499_v2 }
0x2067   :  { %2360 = vmatpush3.msra.mxu1 %v2775_v42 }
0x2068   :  { %2361 = vmatprep.subr.mxu1 %v2499_v2 }
0x2069   :  { %2362 = vmatpush3.msra.mxu1 %v2782_v43 }
0x2122   :  { %v1734_v55 = vpop.f32.mrf.mxu1 }
0x2123   :  { %v1738_v40 = vadd.f32 %v1734_v55, %v1141_v53 }
0x2124   :  { %v2343_v56 = vpop.f32.mrf.mxu1 }
0x2125   :  { %2475 = vtanh.f32 %v1738_v40  ;;  %v2036_v3 = vmul.f32 -1.442695, %v1738_v40 }
0x2127   :  { %2477 = vpow2.f32 %v2036_v3 }
0x2132   :  { %v2476_v57 = vpop.eup %2475 }
0x2133   :  { %1748 = vrot.lane.b32.xlu0 %v2476_v57, %s2501_s11 }
0x2134   :  { %v2478_v41 = vpop.eup %2477 }
0x2135   :  { %v1742_v59 = vadd.f32 1.0, %v2478_v41 }
0x2137   :  { %2479 = vrcp.f32 %v1742_v59 }
0x2144   :  { %v2480_v42 = vpop.eup %2479 }
0x2145   :  { %v1746_v43 = vmul.f32 %v2480_v42, %v1653_v45 }
0x21a5   :  { %v1749_v13 = vpop.permute.xlu0 %1748 }
0x21a6   :  { %v1751_v2 = vmul.f32 %v2480_v42, %v1749_v13 }
0x21a8   :  { %1753 = vrot.lane.b32.xlu1 %v1751_v2, %s2502_s12 }
0x221a   :  { %v1754_v60 = vpop.permute.xlu1 %1753 }
0x221b   :  { %v1756_v49 = vadd.f32 %v1754_v60, %v1746_v43 }
0x221d   :  { %2481 = vtanh.f32 %v1756_v49 }
0x222a   :  { %v2482_v62 = vpop.eup %2481 }
0x222b   :  { %1759 = vrot.lane.b32.xlu0 %v2482_v62, %s2501_s11 }
0x229d   :  { %v1760_v63 = vpop.permute.xlu0 %1759 }
0x229e   :  { %v1762_v0 = vmul.f32 %v2480_v42, %v1760_v63 }
0x22a0   :  { %1764 = vrot.lane.b32.xlu1 %v1762_v0, %s2502_s12 }
0x2312   :  { %v1765_v4 = vpop.permute.xlu1 %1764 }
0x2313   :  { %2037 = vst.msk [vmem:[%s2998_s4 + $0x28] sm:$0xff] %vm49_vm1, %v1765_v4  ;;  %2353 = vmatmul.mubr.msk.f32.vlgmr.msra.gmra.mxu0 %vm49_vm1, %v1765_v4 }
0x23d3   :  { %v1837_v7 = vpop.f32.mrf.mxu0 }
0x23d4   :  { %v1841_v5 = vadd.f32 %v1837_v7, %v1146_v1 }
0x23d5   :  { %v2354_v6 = vpop.f32.mrf.mxu0 }
0x23d6   :  { %2483 = vtanh.f32 %v1841_v5  ;;  %v2039_v8 = vmul.f32 -1.442695, %v1841_v5 }
0x23d8   :  { %2485 = vpow2.f32 %v2039_v8 }
0x23e3   :  { %v2484_v9 = vpop.eup %2483 }
0x23e4   :  { %1851 = vrot.lane.b32.xlu0 %v2484_v9, %s2501_s11 }
0x23e5   :  { %v2486_v10 = vpop.eup %2485 }
0x23e6   :  { %v1845_v58 = vadd.f32 1.0, %v2486_v10 }
0x23e8   :  { %2487 = vrcp.f32 %v1845_v58 }
0x23f5   :  { %v2488_v11 = vpop.eup %2487 }
0x23f6   :  { %v1849_v15 = vmul.f32 %v2488_v11, %v1756_v49 }
0x2456   :  { %v1852_v12 = vpop.permute.xlu0 %1851 }
0x2457   :  { %v1854_v14 = vmul.f32 %v2488_v11, %v1852_v12 }
0x2459   :  { %1856 = vrot.lane.b32.xlu1 %v1854_v14, %s2502_s12 }
0x24cb   :  { %v1857_v16 = vpop.permute.xlu1 %1856 }
0x24cc   :  { %v1859_v52 = vadd.f32 %v1857_v16, %v1849_v15 }
0x24ce   :  { %2489 = vtanh.f32 %v1859_v52 }
0x24db   :  { %v2490_v17 = vpop.eup %2489 }
0x24dc   :  { %1862 = vrot.lane.b32.xlu0 %v2490_v17, %s2501_s11 }
0x254e   :  { %v1863_v18 = vpop.permute.xlu0 %1862 }
0x254f   :  { %v1865_v19 = vmul.f32 %v2488_v11, %v1863_v18 }
0x2551   :  { %1867 = vrot.lane.b32.xlu1 %v1865_v19, %s2502_s12 }
0x25c3   :  { %v1868_v21 = vpop.permute.xlu1 %1867 }
0x25c4   :  { %2040 = vst.msk [vmem:[%s2998_s4 + $0x30] sm:$0xff] %vm49_vm1, %v1868_v21  ;;  %2364 = vmatmul.mubr.msk.f32.vlgmr.msra.gmra.mxu1 %vm49_vm1, %v1868_v21 }
0x2684   :  { %v1940_v23 = vpop.f32.mrf.mxu1 }
0x2685   :  { %v1944_v24 = vadd.f32 %v1940_v23, %v1151_v22 }
0x2686   :  { %v2365_v25 = vpop.f32.mrf.mxu1 }
0x2687   :  { %2491 = vtanh.f32 %v1944_v24  ;;  %v2042_v27 = vmul.f32 -1.442695, %v1944_v24 }
0x2689   :  { %2493 = vpow2.f32 %v2042_v27 }
0x2694   :  { %v2492_v26 = vpop.eup %2491 }
0x2695   :  { %1954 = vrot.lane.b32.xlu0 %v2492_v26, %s2501_s11 }
0x2696   :  { %v2494_v28 = vpop.eup %2493 }
0x2697   :  { %v1948_v29 = vadd.f32 1.0, %v2494_v28 }
0x2699   :  { %2495 = vrcp.f32 %v1948_v29 }
0x26a6   :  { %v2496_v30 = vpop.eup %2495 }
0x26a7   :  { %v1952_v54 = vmul.f32 %v2496_v30, %v1859_v52 }
0x2707   :  { %v1955_v31 = vpop.permute.xlu0 %1954 }
0x2708   :  { %v1957_v32 = vmul.f32 %v2496_v30, %v1955_v31 }
0x270a   :  { %1959 = vrot.lane.b32.xlu1 %v1957_v32, %s2502_s12 }
0x270e   :  { %1006 = vrot.lane.b32.xlu1 %v2842_v20, %s2503_s30 }
0x277c   :  { %v1960_v51 = vpop.permute.xlu1 %1959 }
0x277d   :  { %v1962_v33 = vadd.f32 %v1960_v51, %v1952_v54 }
0x277f   :  { %2497 = vtanh.f32 %v1962_v33  ;;  %1978 = vrot.lane.b32.xlu1 %v1962_v33, %s2503_s30 }
0x2780   :  { %v1007_v34 = vpop.permute.xlu1 %1006 }
0x2781   :  { %2012 = vst.msk [vmem:[%s2998_s4 + $0x50] sm:$0xff] %vm49_vm1, %v1007_v34 }
0x278c   :  { %v2498_v35 = vpop.eup %2497 }
0x278d   :  { %1965 = vrot.lane.b32.xlu0 %v2498_v35, %s2501_s11 }
0x27f1   :  { %v1979_v36 = vpop.permute.xlu1 %1978 }
0x27f2   :  { %2045 = vst.msk [vmem:[%s2998_s4 + $0x58] sm:$0xff] %vm49_vm1, %v1979_v36 }
0x27ff   :  { %v1966_v20 = vpop.permute.xlu0 %1965 }
0x2800   :  { %v1968_v37 = vmul.f32 %v2496_v30, %v1966_v20 }
0x2802   :  { %1970 = vrot.lane.b32.xlu0 %v1968_v37, %s2502_s12 }
0x2874   :  { %v1971_v38 = vpop.permute.xlu0 %1970 }
0x2875   :  { %2043 = vst.msk [vmem:[%s2998_s4 + $0x38] sm:$0xff] %vm49_vm1, %v1971_v38  ;;  %2044 = vst.msk [vmem:[%s2998_s4 + $0x48] sm:$0xff] %vm49_vm1, %v1971_v38 }

</bundles_post_ra>
